<compile_context>
chip_gen: v7x
topology: tpu7x:2x2x1
jax: 0.10.0
libtpu: 0.0.40
codegen_flags: <defaults>
</compile_context>

<pallas_src>
import math

import jax
import jax.numpy as jnp
from jax import lax
from jax.experimental import pallas as pl
from jax.experimental.pallas import tpu as pltpu

INV_TAU = 30.0          # 1 / tau, tau = 1/30 for both attentions
EPS_L2 = 1e-12          # F.normalize eps
EPS_IN = 1e-5           # nn.InstanceNorm2d eps (affine=False, no running stats)
BF = jnp.bfloat16

_C0 = (((0,), (0,)), ((), ()))   # contract axis 0 of both operands (Gram-style)
_NT = (((1,), (1,)), ((), ()))   # contract last axis of both operands


def _l2n_axis0(x):
    # F.normalize(., p=2, dim=-1) applied to the columns of a (KD, L) tile:
    # x * rsqrt(max(sum_sq, eps^2)) == x / max(||x||, eps) up to rounding.
    ss = jnp.sum(x * x, axis=0, keepdims=True)
    return x * lax.rsqrt(jnp.maximum(ss, EPS_L2 * EPS_L2))


def _softmax_last(x):
    x = x - jnp.max(x, axis=-1, keepdims=True)
    e = jnp.exp(x)
    return e / jnp.sum(e, axis=-1, keepdims=True)


def lprop_fused_kernel(tgt_ref, mem_ref, pos_ref,
                       wks_ref, bks_ref, wkc_ref, bkc_ref,
                       out_ref,
                       qn_sc, m_sc, l_sc, acc_sc):
    blk = pl.program_id(1)
    nblk = pl.num_programs(1)
    FB = mem_ref.shape[0]          # frames per grid step (static)
    L = mem_ref.shape[2]           # H*W (static)

    wkc = wkc_ref[...]             # (KD, C) bf16
    bkc = bkc_ref[...]             # (KD, 1) f32
    bkc_b = jnp.broadcast_to(bkc, (bkc.shape[0], L))   # hoisted out of the FB loop

    # ---- once per sequence: self attention + residual + InstanceNorm2d, ----
    # ---- then project the normalized tgt with WK_cross into scratch.    ----
    @pl.when(blk == 0)
    def _init():
        x = tgt_ref[...].astype(jnp.float32)            # (C, Lq) channel-major
        proj = jnp.dot(wks_ref[...], x.astype(BF),
                       preferred_element_type=jnp.float32) + bks_ref[...]   # (KD, Lq)
        qn = _l2n_axis0(proj)                           # (KD, Lq)
        # Gram matrix: scores[q, k] = <qn[:, q], qn[:, k]> — no transpose copy.
        scores = lax.dot_general(qn.astype(BF), qn.astype(BF), _C0,
                                 preferred_element_type=jnp.float32) * INV_TAU
        aff = _softmax_last(scores)                     # (Lq, Lk), softmax over keys
        # attn^T[c, q] = sum_k x[c, k] * aff[q, k]  (value = tgt itself)
        attn_t = lax.dot_general(x.astype(BF), aff.astype(BF), _NT,
                                 preferred_element_type=jnp.float32)        # (C, Lq)
        res = x + attn_t                                # residual: tgt + tgt_attn

        # InstanceNorm2d: per (sequence, channel) over h*w, two-pass variance.
        mean = jnp.mean(res, axis=1, keepdims=True)
        d = res - mean
        var = jnp.mean(d * d, axis=1, keepdims=True)
        tnorm = d * lax.rsqrt(var + EPS_IN)             # (C, Lq)

        projq = jnp.dot(wkc, tnorm.astype(BF),
                        preferred_element_type=jnp.float32) + bkc           # (KD, Lq)
        qn_sc[...] = _l2n_axis0(projq)                  # (KD, Lq), lane-dense in L

        m_sc[...] = jnp.full(m_sc.shape, -jnp.inf, jnp.float32)
        l_sc[...] = jnp.zeros(l_sc.shape, jnp.float32)
        acc_sc[...] = jnp.zeros(acc_sc.shape, jnp.float32)

    # ---- every grid step: one online-softmax update over FB frames. ----
    qn = qn_sc[...].astype(BF)                          # (KD, Lq)

    s_tiles = []
    for f in range(FB):                                 # static, unrolled
        kproj = jnp.dot(wkc, mem_ref[f].astype(BF),
                        preferred_element_type=jnp.float32) + bkc_b         # (KD, Lk)
        kn = _l2n_axis0(kproj)
        s_tiles.append(
            lax.dot_general(kn.astype(BF), qn, _C0,
                            preferred_element_type=jnp.float32) * INV_TAU)  # (Lk, Lq)

    blk_max = s_tiles[0].max(axis=0, keepdims=True)     # (1, Lq)
    for s in s_tiles[1:]:
        blk_max = jnp.maximum(blk_max, s.max(axis=0, keepdims=True))

    m_prev = m_sc[...]
    m_new = jnp.maximum(m_prev, blk_max)                # (1, Lq)
    alpha = jnp.exp(m_prev - m_new)                     # (1, Lq)
    l_new = alpha * l_sc[...]
    acc = alpha * acc_sc[...]                           # (CE, Lq)

    for f in range(FB):
        p = jnp.exp(s_tiles[f] - m_new)                 # (Lk, Lq)
        l_new = l_new + jnp.sum(p, axis=0, keepdims=True)
        # acc[ce, q] += sum_k pos[ce, k] * p[k, q]  (value = pos_enc slice)
        acc = acc + jnp.dot(pos_ref[f].astype(BF), p.astype(BF),
                            preferred_element_type=jnp.float32)             # (CE, Lq)

    m_sc[...] = m_new
    l_sc[...] = l_new
    acc_sc[...] = acc

    # ---- last block: normalize, sigmoid, lane-dense (CE, L) store (no .T). ----
    @pl.when(blk == nblk - 1)
    def _finalize():
        out_ref[...] = jax.nn.sigmoid(acc_sc[...] / l_sc[...]).astype(out_ref.dtype)


def _pick_frame_block(num_frames, bytes_per_frame, budget=4 << 20, cap=8):
    # Largest divisor of num_frames (<= cap) whose block stays under a VMEM
    # budget (double-buffered it is ~2x this, well under v7x's 32 MiB default).
    fb = 1
    for cand in range(1, min(num_frames, cap) + 1):
        if num_frames % cand == 0 and cand * bytes_per_frame <= budget:
            fb = cand
    return fb


def lprop_decoder_layer(tgt, memory, pos_enc, wk_self, bk_self, wk_cross, bk_cross):
    """
    tgt:      (1, S, C, H, W)
    memory:   (F, S, C, H, W)   -- may be bf16 (streamed as-is)
    pos_enc:  (F, S, CE, H, W)  -- may be bf16 (streamed as-is)
    wk_*:     (KD, C)   native nn.Linear weight layout
    bk_*:     (KD,) or (KD, 1)
    returns:  (1, S, CE, H, W) float32
    """
    _, S, C, H, W = tgt.shape
    Fn = memory.shape[0]
    CE = pos_enc.shape[2]
    KD = wk_self.shape[0]
    L = H * W

    # Reshape only (no transposes): the kernel consumes channel-major slabs.
    tgt_r = tgt.reshape(S, C, L)
    mem_r = memory.reshape(Fn, S, C, L)
    pos_r = pos_enc.reshape(Fn, S, CE, L)

    # Tiny weights: pre-cast to bf16 once so the kernel never repacks per step.
    wks = wk_self.astype(jnp.bfloat16)
    wkc = wk_cross.astype(jnp.bfloat16)
    bks = bk_self.reshape(KD, 1).astype(jnp.float32)
    bkc = bk_cross.reshape(KD, 1).astype(jnp.float32)

    bytes_per_frame = (C * L * mem_r.dtype.itemsize
                       + CE * L * pos_r.dtype.itemsize)
    FB = _pick_frame_block(Fn, bytes_per_frame)
    NB = Fn // FB

    out = pl.pallas_call(
        lprop_fused_kernel,
        out_shape=jax.ShapeDtypeStruct((S, CE, L), jnp.float32),
        grid=(S, NB),
        in_specs=[
            pl.BlockSpec((None, C, L), lambda s, b: (s, 0, 0)),             # tgt
            pl.BlockSpec((FB, None, C, L), lambda s, b: (b, s, 0, 0)),      # memory
            pl.BlockSpec((FB, None, CE, L), lambda s, b: (b, s, 0, 0)),     # pos_enc
            pl.BlockSpec((KD, C), lambda s, b: (0, 0)),                     # WK self
            pl.BlockSpec((KD, 1), lambda s, b: (0, 0)),                     # b  self
            pl.BlockSpec((KD, C), lambda s, b: (0, 0)),                     # WK cross
            pl.BlockSpec((KD, 1), lambda s, b: (0, 0)),                     # b  cross
        ],
        out_specs=pl.BlockSpec((None, CE, L), lambda s, b: (s, 0, 0)),
        scratch_shapes=[
            pltpu.VMEM((KD, L), jnp.float32),   # normalized cross-attn query
            pltpu.VMEM((1, L), jnp.float32),    # online-softmax running max
            pltpu.VMEM((1, L), jnp.float32),    # online-softmax running denom
            pltpu.VMEM((CE, L), jnp.float32),   # output accumulator (lane-dense)
        ],
        compiler_params=pltpu.CompilerParams(
            dimension_semantics=("parallel", "arbitrary")),
    )(tgt_r, mem_r, pos_r, wks, bks, wkc, bkc)

    return out.reshape(S, CE, H, W)[None]


if __name__ == "__main__":
    # Small shapes: num_frames=4, num_sequences=2 (keeps both v7x TCs busy via
    # the parallel S axis), feature_dim(c)=32, h=w=8, pos-enc channels ce=16,
    # key_dim=16.
    Fnum, S, C, H, W, CE, KD = 4, 2, 32, 8, 8, 16, 16

    key = jax.random.PRNGKey(0)
    k_tgt, k_mem, k_pos, k_ws, k_wc = jax.random.split(key, 5)

    tgt = jax.random.normal(k_tgt, (1, S, C, H, W), jnp.float32)
    # memory / pos_enc are consumed only as bf16 MXU operands (key / value), so
    # the producer emits them as bf16 and the kernel streams half the HBM bytes
    # (no standalone cast pass is added inside the wrapper).
    memory = jax.random.normal(k_mem, (Fnum, S, C, H, W),
                               jnp.float32).astype(jnp.bfloat16)
    pos_enc = jax.random.normal(k_pos, (Fnum, S, CE, H, W),
                                jnp.float32).astype(jnp.bfloat16)

    # GraphAttention.WK init: weight ~ N(0, sqrt(2/out_features)), bias = 0.
    std = math.sqrt(2.0 / KD)
    wk_self = jax.random.normal(k_ws, (KD, C), jnp.float32) * std
    wk_cross = jax.random.normal(k_wc, (KD, C), jnp.float32) * std
    bk_self = jnp.zeros((KD,), jnp.float32)
    bk_cross = jnp.zeros((KD,), jnp.float32)

    out = lprop_decoder_layer(tgt, memory, pos_enc,
                              wk_self, bk_self, wk_cross, bk_cross)
    out = jax.block_until_ready(out)
    assert out.shape == (1, S, CE, H, W), out.shape
    assert bool(jnp.all(jnp.isfinite(out)))
    print("KERNEL_OK")
</pallas_src>

<mosaic_0001>
module attributes {stable_mosaic.version = 11 : i64} {
  func.func @lprop_fused_kernel(%arg0: i32, %arg1: i32, %arg2: memref<1x32x64xf32, #tpu.memory_space<vmem>>, %arg3: memref<4x1x32x64xbf16, #tpu.memory_space<vmem>>, %arg4: memref<4x1x16x64xbf16, #tpu.memory_space<vmem>>, %arg5: memref<16x32xbf16, #tpu.memory_space<vmem>>, %arg6: memref<16x1xf32, #tpu.memory_space<vmem>>, %arg7: memref<16x32xbf16, #tpu.memory_space<vmem>>, %arg8: memref<16x1xf32, #tpu.memory_space<vmem>>, %arg9: memref<1x16x64xf32, #tpu.memory_space<vmem>>, %arg10: memref<16x64xf32, #tpu.memory_space<vmem>>, %arg11: memref<1x64xf32, #tpu.memory_space<vmem>>, %arg12: memref<1x64xf32, #tpu.memory_space<vmem>>, %arg13: memref<16x64xf32, #tpu.memory_space<vmem>>) attributes {dimension_semantics = [#tpu.dimension_semantics<parallel>, #tpu.dimension_semantics<arbitrary>], iteration_bounds = array<i64: 2, 1>, scalar_prefetch = 0 : i64, scratch_operands = 4 : i64, tpu.core_type = #tpu.core_type<tc>, window_params = [{transform_indices = @transform_0, window_bounds = array<i64: 1, 32, 64>}, {transform_indices = @transform_1, window_bounds = array<i64: 4, 1, 32, 64>}, {transform_indices = @transform_2, window_bounds = array<i64: 4, 1, 16, 64>}, {pipeline_mode = #tpu.pipeline_mode<synchronous>, transform_indices = @transform_3, window_bounds = array<i64: 16, 32>}, {pipeline_mode = #tpu.pipeline_mode<synchronous>, transform_indices = @transform_4, window_bounds = array<i64: 16, 1>}, {pipeline_mode = #tpu.pipeline_mode<synchronous>, transform_indices = @transform_5, window_bounds = array<i64: 16, 32>}, {pipeline_mode = #tpu.pipeline_mode<synchronous>, transform_indices = @transform_6, window_bounds = array<i64: 16, 1>}, {transform_indices = @transform_7, window_bounds = array<i64: 1, 16, 64>}]} {
    %c0 = arith.constant 0 : index
    %c0_0 = arith.constant 0 : index
    %0 = vector.load %arg7[%c0, %c0_0] : memref<16x32xbf16, #tpu.memory_space<vmem>>, vector<16x32xbf16>
    %c0_1 = arith.constant 0 : index
    %c0_2 = arith.constant 0 : index
    %1 = vector.load %arg8[%c0_1, %c0_2] : memref<16x1xf32, #tpu.memory_space<vmem>>, vector<16x1xf32>
    %2 = vector.shape_cast %1 : vector<16x1xf32> to vector<16x1xf32>
    %3 = vector.broadcast %2 : vector<16x1xf32> to vector<16x64xf32>
    %c0_i32 = arith.constant 0 : i32
    %4 = arith.cmpi eq, %arg1, %c0_i32 : i32
    %5 = arith.extui %4 : i1 to i32
    %c0_i32_3 = arith.constant 0 : i32
    %6 = arith.cmpi ne, %5, %c0_i32_3 : i32
    scf.if %6 {
      %c0_80 = arith.constant 0 : index
      %c0_81 = arith.constant 0 : index
      %c0_82 = arith.constant 0 : index
      %143 = vector.load %arg2[%c0_80, %c0_81, %c0_82] : memref<1x32x64xf32, #tpu.memory_space<vmem>>, vector<1x32x64xf32>
      %144 = vector.shape_cast %143 : vector<1x32x64xf32> to vector<32x64xf32>
      %c0_83 = arith.constant 0 : index
      %c0_84 = arith.constant 0 : index
      %145 = vector.load %arg5[%c0_83, %c0_84] : memref<16x32xbf16, #tpu.memory_space<vmem>>, vector<16x32xbf16>
      %146 = arith.truncf %144 : vector<32x64xf32> to vector<32x64xbf16>
      %cst_85 = arith.constant dense<0.000000e+00> : vector<16x64xf32>
      %147 = tpu.matmul %145, %146, %cst_85 {dimension_numbers = #tpu.dot_dimension_numbers<[1], [0], [0], [1], [0, 0, 1, 1], [], []>} : vector<16x32xbf16>, vector<32x64xbf16>, vector<16x64xf32> -> vector<16x64xf32>
      %c0_86 = arith.constant 0 : index
      %c0_87 = arith.constant 0 : index
      %148 = vector.load %arg6[%c0_86, %c0_87] : memref<16x1xf32, #tpu.memory_space<vmem>>, vector<16x1xf32>
      %149 = vector.broadcast %148 : vector<16x1xf32> to vector<16x64xf32>
      %150 = arith.addf %147, %149 : vector<16x64xf32>
      %151 = arith.mulf %150, %150 : vector<16x64xf32>
      %cst_88 = arith.constant dense<0.000000e+00> : vector<64xf32>
      %152 = vector.multi_reduction <add>, %151, %cst_88 [0] : vector<16x64xf32> to vector<64xf32>
      %153 = vector.shape_cast %152 : vector<64xf32> to vector<1x64xf32>
      %cst_89 = arith.constant 1.000000e-24 : f32
      %154 = vector.broadcast %cst_89 : f32 to vector<1x64xf32>
      %155 = arith.maximumf %153, %154 : vector<1x64xf32>
      %156 = math.rsqrt %155 : vector<1x64xf32>
      %157 = vector.broadcast %156 : vector<1x64xf32> to vector<16x64xf32>
      %158 = arith.mulf %150, %157 : vector<16x64xf32>
      %159 = arith.truncf %158 : vector<16x64xf32> to vector<16x64xbf16>
      %160 = arith.truncf %158 : vector<16x64xf32> to vector<16x64xbf16>
      %cst_90 = arith.constant dense<0.000000e+00> : vector<64x64xf32>
      %161 = tpu.matmul %159, %160, %cst_90 {dimension_numbers = #tpu.dot_dimension_numbers<[0], [0], [1], [1], [0, 1, 1, 1], [], []>} : vector<16x64xbf16>, vector<16x64xbf16>, vector<64x64xf32> -> vector<64x64xf32>
      %cst_91 = arith.constant 3.000000e+01 : f32
      %162 = vector.broadcast %cst_91 : f32 to vector<64x64xf32>
      %163 = arith.mulf %161, %162 : vector<64x64xf32>
      %cst_92 = arith.constant dense<0xFF800000> : vector<64xf32>
      %164 = vector.multi_reduction <maximumf>, %163, %cst_92 [1] : vector<64x64xf32> to vector<64xf32>
      %165 = vector.shape_cast %164 : vector<64xf32> to vector<64x1xf32>
      %166 = vector.broadcast %165 : vector<64x1xf32> to vector<64x64xf32>
      %167 = arith.subf %163, %166 : vector<64x64xf32>
      %168 = math.exp %167 : vector<64x64xf32>
      %cst_93 = arith.constant dense<0.000000e+00> : vector<64xf32>
      %169 = vector.multi_reduction <add>, %168, %cst_93 [1] : vector<64x64xf32> to vector<64xf32>
      %170 = vector.shape_cast %169 : vector<64xf32> to vector<64x1xf32>
      %171 = vector.broadcast %170 : vector<64x1xf32> to vector<64x64xf32>
      %172 = arith.divf %168, %171 : vector<64x64xf32>
      %173 = arith.truncf %144 : vector<32x64xf32> to vector<32x64xbf16>
      %174 = arith.truncf %172 : vector<64x64xf32> to vector<64x64xbf16>
      %cst_94 = arith.constant dense<0.000000e+00> : vector<32x64xf32>
      %175 = tpu.matmul %173, %174, %cst_94 {dimension_numbers = #tpu.dot_dimension_numbers<[1], [1], [0], [0], [0, 0, 1, 0], [], []>} : vector<32x64xbf16>, vector<64x64xbf16>, vector<32x64xf32> -> vector<32x64xf32>
      %176 = arith.addf %144, %175 : vector<32x64xf32>
      %cst_95 = arith.constant dense<0.000000e+00> : vector<32xf32>
      %177 = vector.multi_reduction <add>, %176, %cst_95 [1] : vector<32x64xf32> to vector<32xf32>
      %178 = vector.shape_cast %177 : vector<32xf32> to vector<32x1xf32>
      %cst_96 = arith.constant 6.400000e+01 : f32
      %179 = vector.broadcast %cst_96 : f32 to vector<32x1xf32>
      %180 = arith.divf %178, %179 : vector<32x1xf32>
      %181 = vector.broadcast %180 : vector<32x1xf32> to vector<32x64xf32>
      %182 = arith.subf %176, %181 : vector<32x64xf32>
      %183 = arith.mulf %182, %182 : vector<32x64xf32>
      %cst_97 = arith.constant dense<0.000000e+00> : vector<32xf32>
      %184 = vector.multi_reduction <add>, %183, %cst_97 [1] : vector<32x64xf32> to vector<32xf32>
      %185 = vector.shape_cast %184 : vector<32xf32> to vector<32x1xf32>
      %cst_98 = arith.constant 6.400000e+01 : f32
      %186 = vector.broadcast %cst_98 : f32 to vector<32x1xf32>
      %187 = arith.divf %185, %186 : vector<32x1xf32>
      %cst_99 = arith.constant 9.99999974E-6 : f32
      %188 = vector.broadcast %cst_99 : f32 to vector<32x1xf32>
      %189 = arith.addf %187, %188 : vector<32x1xf32>
      %190 = math.rsqrt %189 : vector<32x1xf32>
      %191 = vector.broadcast %190 : vector<32x1xf32> to vector<32x64xf32>
      %192 = arith.mulf %182, %191 : vector<32x64xf32>
      %193 = arith.truncf %192 : vector<32x64xf32> to vector<32x64xbf16>
      %cst_100 = arith.constant dense<0.000000e+00> : vector<16x64xf32>
      %194 = tpu.matmul %0, %193, %cst_100 {dimension_numbers = #tpu.dot_dimension_numbers<[1], [0], [0], [1], [0, 0, 1, 1], [], []>} : vector<16x32xbf16>, vector<32x64xbf16>, vector<16x64xf32> -> vector<16x64xf32>
      %195 = vector.broadcast %1 : vector<16x1xf32> to vector<16x64xf32>
      %196 = arith.addf %194, %195 : vector<16x64xf32>
      %197 = arith.mulf %196, %196 : vector<16x64xf32>
      %cst_101 = arith.constant dense<0.000000e+00> : vector<64xf32>
      %198 = vector.multi_reduction <add>, %197, %cst_101 [0] : vector<16x64xf32> to vector<64xf32>
      %199 = vector.shape_cast %198 : vector<64xf32> to vector<1x64xf32>
      %cst_102 = arith.constant 1.000000e-24 : f32
      %200 = vector.broadcast %cst_102 : f32 to vector<1x64xf32>
      %201 = arith.maximumf %199, %200 : vector<1x64xf32>
      %202 = math.rsqrt %201 : vector<1x64xf32>
      %203 = vector.broadcast %202 : vector<1x64xf32> to vector<16x64xf32>
      %204 = arith.mulf %196, %203 : vector<16x64xf32>
      %c0_103 = arith.constant 0 : index
      %c0_104 = arith.constant 0 : index
      %205 = vector.load %arg10[%c0_103, %c0_104] : memref<16x64xf32, #tpu.memory_space<vmem>>, vector<16x64xf32>
      tpu.vector_store %arg10[%c0_103, %c0_104], %204 {strides = array<i32>} : memref<16x64xf32, #tpu.memory_space<vmem>>, vector<16x64xf32>,
      %cst_105 = arith.constant 0xFF800000 : f32
      %206 = vector.broadcast %cst_105 : f32 to vector<1x64xf32>
      %c0_106 = arith.constant 0 : index
      %c0_107 = arith.constant 0 : index
      %207 = vector.load %arg11[%c0_106, %c0_107] : memref<1x64xf32, #tpu.memory_space<vmem>>, vector<1x64xf32>
      tpu.vector_store %arg11[%c0_106, %c0_107], %206 {strides = array<i32>} : memref<1x64xf32, #tpu.memory_space<vmem>>, vector<1x64xf32>,
      %cst_108 = arith.constant 0.000000e+00 : f32
      %208 = vector.broadcast %cst_108 : f32 to vector<1x64xf32>
      %c0_109 = arith.constant 0 : index
      %c0_110 = arith.constant 0 : index
      %209 = vector.load %arg12[%c0_109, %c0_110] : memref<1x64xf32, #tpu.memory_space<vmem>>, vector<1x64xf32>
      tpu.vector_store %arg12[%c0_109, %c0_110], %208 {strides = array<i32>} : memref<1x64xf32, #tpu.memory_space<vmem>>, vector<1x64xf32>,
      %cst_111 = arith.constant 0.000000e+00 : f32
      %210 = vector.broadcast %cst_111 : f32 to vector<16x64xf32>
      %c0_112 = arith.constant 0 : index
      %c0_113 = arith.constant 0 : index
      %211 = vector.load %arg13[%c0_112, %c0_113] : memref<16x64xf32, #tpu.memory_space<vmem>>, vector<16x64xf32>
      tpu.vector_store %arg13[%c0_112, %c0_113], %210 {strides = array<i32>} : memref<16x64xf32, #tpu.memory_space<vmem>>, vector<16x64xf32>,
    } else {
    }
    %c0_4 = arith.constant 0 : index
    %c0_5 = arith.constant 0 : index
    %7 = vector.load %arg10[%c0_4, %c0_5] : memref<16x64xf32, #tpu.memory_space<vmem>>, vector<16x64xf32>
    %8 = arith.truncf %7 : vector<16x64xf32> to vector<16x64xbf16>
    %c0_6 = arith.constant 0 : index
    %c0_7 = arith.constant 0 : index
    %c0_8 = arith.constant 0 : index
    %c0_9 = arith.constant 0 : index
    %9 = vector.load %arg3[%c0_6, %c0_7, %c0_8, %c0_9] : memref<4x1x32x64xbf16, #tpu.memory_space<vmem>>, vector<1x1x32x64xbf16>
    %10 = vector.shape_cast %9 : vector<1x1x32x64xbf16> to vector<32x64xbf16>
    %cst = arith.constant dense<0.000000e+00> : vector<16x64xf32>
    %11 = tpu.matmul %0, %10, %cst {dimension_numbers = #tpu.dot_dimension_numbers<[1], [0], [0], [1], [0, 0, 1, 1], [], []>} : vector<16x32xbf16>, vector<32x64xbf16>, vector<16x64xf32> -> vector<16x64xf32>
    %12 = arith.addf %11, %3 : vector<16x64xf32>
    %13 = arith.mulf %12, %12 : vector<16x64xf32>
    %cst_10 = arith.constant dense<0.000000e+00> : vector<64xf32>
    %14 = vector.multi_reduction <add>, %13, %cst_10 [0] : vector<16x64xf32> to vector<64xf32>
    %15 = vector.shape_cast %14 : vector<64xf32> to vector<1x64xf32>
    %cst_11 = arith.constant 1.000000e-24 : f32
    %16 = vector.broadcast %cst_11 : f32 to vector<1x64xf32>
    %17 = arith.maximumf %15, %16 : vector<1x64xf32>
    %18 = math.rsqrt %17 : vector<1x64xf32>
    %19 = vector.broadcast %18 : vector<1x64xf32> to vector<16x64xf32>
    %20 = arith.mulf %12, %19 : vector<16x64xf32>
    %21 = arith.truncf %20 : vector<16x64xf32> to vector<16x64xbf16>
    %cst_12 = arith.constant dense<0.000000e+00> : vector<64x64xf32>
    %22 = tpu.matmul %21, %8, %cst_12 {dimension_numbers = #tpu.dot_dimension_numbers<[0], [0], [1], [1], [0, 1, 1, 1], [], []>} : vector<16x64xbf16>, vector<16x64xbf16>, vector<64x64xf32> -> vector<64x64xf32>
    %cst_13 = arith.constant 3.000000e+01 : f32
    %23 = vector.broadcast %cst_13 : f32 to vector<64x64xf32>
    %24 = arith.mulf %22, %23 : vector<64x64xf32>
    %c1 = arith.constant 1 : index
    %c0_14 = arith.constant 0 : index
    %c0_15 = arith.constant 0 : index
    %c0_16 = arith.constant 0 : index
    %25 = vector.load %arg3[%c1, %c0_14, %c0_15, %c0_16] : memref<4x1x32x64xbf16, #tpu.memory_space<vmem>>, vector<1x1x32x64xbf16>
    %26 = vector.shape_cast %25 : vector<1x1x32x64xbf16> to vector<32x64xbf16>
    %cst_17 = arith.constant dense<0.000000e+00> : vector<16x64xf32>
    %27 = tpu.matmul %0, %26, %cst_17 {dimension_numbers = #tpu.dot_dimension_numbers<[1], [0], [0], [1], [0, 0, 1, 1], [], []>} : vector<16x32xbf16>, vector<32x64xbf16>, vector<16x64xf32> -> vector<16x64xf32>
    %28 = arith.addf %27, %3 : vector<16x64xf32>
    %29 = arith.mulf %28, %28 : vector<16x64xf32>
    %cst_18 = arith.constant dense<0.000000e+00> : vector<64xf32>
    %30 = vector.multi_reduction <add>, %29, %cst_18 [0] : vector<16x64xf32> to vector<64xf32>
    %31 = vector.shape_cast %30 : vector<64xf32> to vector<1x64xf32>
    %cst_19 = arith.constant 1.000000e-24 : f32
    %32 = vector.broadcast %cst_19 : f32 to vector<1x64xf32>
    %33 = arith.maximumf %31, %32 : vector<1x64xf32>
    %34 = math.rsqrt %33 : vector<1x64xf32>
    %35 = vector.broadcast %34 : vector<1x64xf32> to vector<16x64xf32>
    %36 = arith.mulf %28, %35 : vector<16x64xf32>
    %37 = arith.truncf %36 : vector<16x64xf32> to vector<16x64xbf16>
    %cst_20 = arith.constant dense<0.000000e+00> : vector<64x64xf32>
    %38 = tpu.matmul %37, %8, %cst_20 {dimension_numbers = #tpu.dot_dimension_numbers<[0], [0], [1], [1], [0, 1, 1, 1], [], []>} : vector<16x64xbf16>, vector<16x64xbf16>, vector<64x64xf32> -> vector<64x64xf32>
    %cst_21 = arith.constant 3.000000e+01 : f32
    %39 = vector.broadcast %cst_21 : f32 to vector<64x64xf32>
    %40 = arith.mulf %38, %39 : vector<64x64xf32>
    %c2 = arith.constant 2 : index
    %c0_22 = arith.constant 0 : index
    %c0_23 = arith.constant 0 : index
    %c0_24 = arith.constant 0 : index
    %41 = vector.load %arg3[%c2, %c0_22, %c0_23, %c0_24] : memref<4x1x32x64xbf16, #tpu.memory_space<vmem>>, vector<1x1x32x64xbf16>
    %42 = vector.shape_cast %41 : vector<1x1x32x64xbf16> to vector<32x64xbf16>
    %cst_25 = arith.constant dense<0.000000e+00> : vector<16x64xf32>
    %43 = tpu.matmul %0, %42, %cst_25 {dimension_numbers = #tpu.dot_dimension_numbers<[1], [0], [0], [1], [0, 0, 1, 1], [], []>} : vector<16x32xbf16>, vector<32x64xbf16>, vector<16x64xf32> -> vector<16x64xf32>
    %44 = arith.addf %43, %3 : vector<16x64xf32>
    %45 = arith.mulf %44, %44 : vector<16x64xf32>
    %cst_26 = arith.constant dense<0.000000e+00> : vector<64xf32>
    %46 = vector.multi_reduction <add>, %45, %cst_26 [0] : vector<16x64xf32> to vector<64xf32>
    %47 = vector.shape_cast %46 : vector<64xf32> to vector<1x64xf32>
    %cst_27 = arith.constant 1.000000e-24 : f32
    %48 = vector.broadcast %cst_27 : f32 to vector<1x64xf32>
    %49 = arith.maximumf %47, %48 : vector<1x64xf32>
    %50 = math.rsqrt %49 : vector<1x64xf32>
    %51 = vector.broadcast %50 : vector<1x64xf32> to vector<16x64xf32>
    %52 = arith.mulf %44, %51 : vector<16x64xf32>
    %53 = arith.truncf %52 : vector<16x64xf32> to vector<16x64xbf16>
    %cst_28 = arith.constant dense<0.000000e+00> : vector<64x64xf32>
    %54 = tpu.matmul %53, %8, %cst_28 {dimension_numbers = #tpu.dot_dimension_numbers<[0], [0], [1], [1], [0, 1, 1, 1], [], []>} : vector<16x64xbf16>, vector<16x64xbf16>, vector<64x64xf32> -> vector<64x64xf32>
    %cst_29 = arith.constant 3.000000e+01 : f32
    %55 = vector.broadcast %cst_29 : f32 to vector<64x64xf32>
    %56 = arith.mulf %54, %55 : vector<64x64xf32>
    %c3 = arith.constant 3 : index
    %c0_30 = arith.constant 0 : index
    %c0_31 = arith.constant 0 : index
    %c0_32 = arith.constant 0 : index
    %57 = vector.load %arg3[%c3, %c0_30, %c0_31, %c0_32] : memref<4x1x32x64xbf16, #tpu.memory_space<vmem>>, vector<1x1x32x64xbf16>
    %58 = vector.shape_cast %57 : vector<1x1x32x64xbf16> to vector<32x64xbf16>
    %cst_33 = arith.constant dense<0.000000e+00> : vector<16x64xf32>
    %59 = tpu.matmul %0, %58, %cst_33 {dimension_numbers = #tpu.dot_dimension_numbers<[1], [0], [0], [1], [0, 0, 1, 1], [], []>} : vector<16x32xbf16>, vector<32x64xbf16>, vector<16x64xf32> -> vector<16x64xf32>
    %60 = arith.addf %59, %3 : vector<16x64xf32>
    %61 = arith.mulf %60, %60 : vector<16x64xf32>
    %cst_34 = arith.constant dense<0.000000e+00> : vector<64xf32>
    %62 = vector.multi_reduction <add>, %61, %cst_34 [0] : vector<16x64xf32> to vector<64xf32>
    %63 = vector.shape_cast %62 : vector<64xf32> to vector<1x64xf32>
    %cst_35 = arith.constant 1.000000e-24 : f32
    %64 = vector.broadcast %cst_35 : f32 to vector<1x64xf32>
    %65 = arith.maximumf %63, %64 : vector<1x64xf32>
    %66 = math.rsqrt %65 : vector<1x64xf32>
    %67 = vector.broadcast %66 : vector<1x64xf32> to vector<16x64xf32>
    %68 = arith.mulf %60, %67 : vector<16x64xf32>
    %69 = arith.truncf %68 : vector<16x64xf32> to vector<16x64xbf16>
    %cst_36 = arith.constant dense<0.000000e+00> : vector<64x64xf32>
    %70 = tpu.matmul %69, %8, %cst_36 {dimension_numbers = #tpu.dot_dimension_numbers<[0], [0], [1], [1], [0, 1, 1, 1], [], []>} : vector<16x64xbf16>, vector<16x64xbf16>, vector<64x64xf32> -> vector<64x64xf32>
    %cst_37 = arith.constant 3.000000e+01 : f32
    %71 = vector.broadcast %cst_37 : f32 to vector<64x64xf32>
    %72 = arith.mulf %70, %71 : vector<64x64xf32>
    %cst_38 = arith.constant dense<0xFF800000> : vector<64xf32>
    %73 = vector.multi_reduction <maximumf>, %24, %cst_38 [0] : vector<64x64xf32> to vector<64xf32>
    %74 = vector.shape_cast %73 : vector<64xf32> to vector<1x64xf32>
    %cst_39 = arith.constant dense<0xFF800000> : vector<64xf32>
    %75 = vector.multi_reduction <maximumf>, %40, %cst_39 [0] : vector<64x64xf32> to vector<64xf32>
    %76 = vector.shape_cast %75 : vector<64xf32> to vector<1x64xf32>
    %77 = arith.maximumf %74, %76 : vector<1x64xf32>
    %cst_40 = arith.constant dense<0xFF800000> : vector<64xf32>
    %78 = vector.multi_reduction <maximumf>, %56, %cst_40 [0] : vector<64x64xf32> to vector<64xf32>
    %79 = vector.shape_cast %78 : vector<64xf32> to vector<1x64xf32>
    %80 = arith.maximumf %77, %79 : vector<1x64xf32>
    %cst_41 = arith.constant dense<0xFF800000> : vector<64xf32>
    %81 = vector.multi_reduction <maximumf>, %72, %cst_41 [0] : vector<64x64xf32> to vector<64xf32>
    %82 = vector.shape_cast %81 : vector<64xf32> to vector<1x64xf32>
    %83 = arith.maximumf %80, %82 : vector<1x64xf32>
    %c0_42 = arith.constant 0 : index
    %c0_43 = arith.constant 0 : index
    %84 = vector.load %arg11[%c0_42, %c0_43] : memref<1x64xf32, #tpu.memory_space<vmem>>, vector<1x64xf32>
    %85 = arith.maximumf %84, %83 : vector<1x64xf32>
    %86 = arith.subf %84, %85 : vector<1x64xf32>
    %87 = math.exp %86 : vector<1x64xf32>
    %c0_44 = arith.constant 0 : index
    %c0_45 = arith.constant 0 : index
    %88 = vector.load %arg12[%c0_44, %c0_45] : memref<1x64xf32, #tpu.memory_space<vmem>>, vector<1x64xf32>
    %89 = arith.mulf %87, %88 : vector<1x64xf32>
    %c0_46 = arith.constant 0 : index
    %c0_47 = arith.constant 0 : index
    %90 = vector.load %arg13[%c0_46, %c0_47] : memref<16x64xf32, #tpu.memory_space<vmem>>, vector<16x64xf32>
    %91 = vector.broadcast %87 : vector<1x64xf32> to vector<16x64xf32>
    %92 = arith.mulf %91, %90 : vector<16x64xf32>
    %93 = vector.broadcast %85 : vector<1x64xf32> to vector<64x64xf32>
    %94 = arith.subf %24, %93 : vector<64x64xf32>
    %95 = math.exp %94 : vector<64x64xf32>
    %cst_48 = arith.constant dense<0.000000e+00> : vector<64xf32>
    %96 = vector.multi_reduction <add>, %95, %cst_48 [0] : vector<64x64xf32> to vector<64xf32>
    %97 = vector.shape_cast %96 : vector<64xf32> to vector<1x64xf32>
    %98 = arith.addf %89, %97 : vector<1x64xf32>
    %c0_49 = arith.constant 0 : index
    %c0_50 = arith.constant 0 : index
    %c0_51 = arith.constant 0 : index
    %c0_52 = arith.constant 0 : index
    %99 = vector.load %arg4[%c0_49, %c0_50, %c0_51, %c0_52] : memref<4x1x16x64xbf16, #tpu.memory_space<vmem>>, vector<1x1x16x64xbf16>
    %100 = vector.shape_cast %99 : vector<1x1x16x64xbf16> to vector<16x64xbf16>
    %101 = arith.truncf %95 : vector<64x64xf32> to vector<64x64xbf16>
    %cst_53 = arith.constant dense<0.000000e+00> : vector<16x64xf32>
    %102 = tpu.matmul %100, %101, %cst_53 {dimension_numbers = #tpu.dot_dimension_numbers<[1], [0], [0], [1], [0, 0, 1, 1], [], []>} : vector<16x64xbf16>, vector<64x64xbf16>, vector<16x64xf32> -> vector<16x64xf32>
    %103 = arith.addf %92, %102 : vector<16x64xf32>
    %104 = vector.broadcast %85 : vector<1x64xf32> to vector<64x64xf32>
    %105 = arith.subf %40, %104 : vector<64x64xf32>
    %106 = math.exp %105 : vector<64x64xf32>
    %cst_54 = arith.constant dense<0.000000e+00> : vector<64xf32>
    %107 = vector.multi_reduction <add>, %106, %cst_54 [0] : vector<64x64xf32> to vector<64xf32>
    %108 = vector.shape_cast %107 : vector<64xf32> to vector<1x64xf32>
    %109 = arith.addf %98, %108 : vector<1x64xf32>
    %c1_55 = arith.constant 1 : index
    %c0_56 = arith.constant 0 : index
    %c0_57 = arith.constant 0 : index
    %c0_58 = arith.constant 0 : index
    %110 = vector.load %arg4[%c1_55, %c0_56, %c0_57, %c0_58] : memref<4x1x16x64xbf16, #tpu.memory_space<vmem>>, vector<1x1x16x64xbf16>
    %111 = vector.shape_cast %110 : vector<1x1x16x64xbf16> to vector<16x64xbf16>
    %112 = arith.truncf %106 : vector<64x64xf32> to vector<64x64xbf16>
    %cst_59 = arith.constant dense<0.000000e+00> : vector<16x64xf32>
    %113 = tpu.matmul %111, %112, %cst_59 {dimension_numbers = #tpu.dot_dimension_numbers<[1], [0], [0], [1], [0, 0, 1, 1], [], []>} : vector<16x64xbf16>, vector<64x64xbf16>, vector<16x64xf32> -> vector<16x64xf32>
    %114 = arith.addf %103, %113 : vector<16x64xf32>
    %115 = vector.broadcast %85 : vector<1x64xf32> to vector<64x64xf32>
    %116 = arith.subf %56, %115 : vector<64x64xf32>
    %117 = math.exp %116 : vector<64x64xf32>
    %cst_60 = arith.constant dense<0.000000e+00> : vector<64xf32>
    %118 = vector.multi_reduction <add>, %117, %cst_60 [0] : vector<64x64xf32> to vector<64xf32>
    %119 = vector.shape_cast %118 : vector<64xf32> to vector<1x64xf32>
    %120 = arith.addf %109, %119 : vector<1x64xf32>
    %c2_61 = arith.constant 2 : index
    %c0_62 = arith.constant 0 : index
    %c0_63 = arith.constant 0 : index
    %c0_64 = arith.constant 0 : index
    %121 = vector.load %arg4[%c2_61, %c0_62, %c0_63, %c0_64] : memref<4x1x16x64xbf16, #tpu.memory_space<vmem>>, vector<1x1x16x64xbf16>
    %122 = vector.shape_cast %121 : vector<1x1x16x64xbf16> to vector<16x64xbf16>
    %123 = arith.truncf %117 : vector<64x64xf32> to vector<64x64xbf16>
    %cst_65 = arith.constant dense<0.000000e+00> : vector<16x64xf32>
    %124 = tpu.matmul %122, %123, %cst_65 {dimension_numbers = #tpu.dot_dimension_numbers<[1], [0], [0], [1], [0, 0, 1, 1], [], []>} : vector<16x64xbf16>, vector<64x64xbf16>, vector<16x64xf32> -> vector<16x64xf32>
    %125 = arith.addf %114, %124 : vector<16x64xf32>
    %126 = vector.broadcast %85 : vector<1x64xf32> to vector<64x64xf32>
    %127 = arith.subf %72, %126 : vector<64x64xf32>
    %128 = math.exp %127 : vector<64x64xf32>
    %cst_66 = arith.constant dense<0.000000e+00> : vector<64xf32>
    %129 = vector.multi_reduction <add>, %128, %cst_66 [0] : vector<64x64xf32> to vector<64xf32>
    %130 = vector.shape_cast %129 : vector<64xf32> to vector<1x64xf32>
    %131 = arith.addf %120, %130 : vector<1x64xf32>
    %c3_67 = arith.constant 3 : index
    %c0_68 = arith.constant 0 : index
    %c0_69 = arith.constant 0 : index
    %c0_70 = arith.constant 0 : index
    %132 = vector.load %arg4[%c3_67, %c0_68, %c0_69, %c0_70] : memref<4x1x16x64xbf16, #tpu.memory_space<vmem>>, vector<1x1x16x64xbf16>
    %133 = vector.shape_cast %132 : vector<1x1x16x64xbf16> to vector<16x64xbf16>
    %134 = arith.truncf %128 : vector<64x64xf32> to vector<64x64xbf16>
    %cst_71 = arith.constant dense<0.000000e+00> : vector<16x64xf32>
    %135 = tpu.matmul %133, %134, %cst_71 {dimension_numbers = #tpu.dot_dimension_numbers<[1], [0], [0], [1], [0, 0, 1, 1], [], []>} : vector<16x64xbf16>, vector<64x64xbf16>, vector<16x64xf32> -> vector<16x64xf32>
    %136 = arith.addf %125, %135 : vector<16x64xf32>
    %c0_72 = arith.constant 0 : index
    %c0_73 = arith.constant 0 : index
    %137 = vector.load %arg11[%c0_72, %c0_73] : memref<1x64xf32, #tpu.memory_space<vmem>>, vector<1x64xf32>
    tpu.vector_store %arg11[%c0_72, %c0_73], %85 {strides = array<i32>} : memref<1x64xf32, #tpu.memory_space<vmem>>, vector<1x64xf32>,
    %c0_74 = arith.constant 0 : index
    %c0_75 = arith.constant 0 : index
    %138 = vector.load %arg12[%c0_74, %c0_75] : memref<1x64xf32, #tpu.memory_space<vmem>>, vector<1x64xf32>
    tpu.vector_store %arg12[%c0_74, %c0_75], %131 {strides = array<i32>} : memref<1x64xf32, #tpu.memory_space<vmem>>, vector<1x64xf32>,
    %c0_76 = arith.constant 0 : index
    %c0_77 = arith.constant 0 : index
    %139 = vector.load %arg13[%c0_76, %c0_77] : memref<16x64xf32, #tpu.memory_space<vmem>>, vector<16x64xf32>
    tpu.vector_store %arg13[%c0_76, %c0_77], %136 {strides = array<i32>} : memref<16x64xf32, #tpu.memory_space<vmem>>, vector<16x64xf32>,
    %c0_i32_78 = arith.constant 0 : i32
    %140 = arith.cmpi eq, %arg1, %c0_i32_78 : i32
    %141 = arith.extui %140 : i1 to i32
    %c0_i32_79 = arith.constant 0 : i32
    %142 = arith.cmpi ne, %141, %c0_i32_79 : i32
    scf.if %142 {
      %c0_80 = arith.constant 0 : index
      %c0_81 = arith.constant 0 : index
      %143 = vector.load %arg13[%c0_80, %c0_81] : memref<16x64xf32, #tpu.memory_space<vmem>>, vector<16x64xf32>
      %c0_82 = arith.constant 0 : index
      %c0_83 = arith.constant 0 : index
      %144 = vector.load %arg12[%c0_82, %c0_83] : memref<1x64xf32, #tpu.memory_space<vmem>>, vector<1x64xf32>
      %145 = vector.broadcast %144 : vector<1x64xf32> to vector<16x64xf32>
      %146 = arith.divf %143, %145 : vector<16x64xf32>
      %147 = arith.negf %146 : vector<16x64xf32>
      %148 = math.exp %147 : vector<16x64xf32>
      %cst_84 = arith.constant 1.000000e+00 : f32
      %149 = vector.broadcast %cst_84 : f32 to vector<16x64xf32>
      %150 = arith.addf %149, %148 : vector<16x64xf32>
      %151 = arith.divf %149, %150 : vector<16x64xf32>
      %c0_85 = arith.constant 0 : index
      %c0_86 = arith.constant 0 : index
      %c0_87 = arith.constant 0 : index
      %152 = vector.load %arg9[%c0_85, %c0_86, %c0_87] : memref<1x16x64xf32, #tpu.memory_space<vmem>>, vector<1x16x64xf32>
      %153 = vector.shape_cast %152 : vector<1x16x64xf32> to vector<16x64xf32>
      %154 = vector.shape_cast %151 : vector<16x64xf32> to vector<1x16x64xf32>
      tpu.vector_store %arg9[%c0_85, %c0_86, %c0_87], %154 {strides = array<i32>} : memref<1x16x64xf32, #tpu.memory_space<vmem>>, vector<1x16x64xf32>,
    } else {
    }
    return
  }
  func.func @transform_0(%arg0: i32, %arg1: i32) -> (i32, i32, i32) {
    %c0_i32 = arith.constant 0 : i32
    %c0_i32_0 = arith.constant 0 : i32
    %c0_i32_1 = arith.constant 0 : i32
    return %arg0, %c0_i32, %c0_i32_0 : i32, i32, i32
  }
  func.func @transform_1(%arg0: i32, %arg1: i32) -> (i32, i32, i32, i32) {
    %c0_i32 = arith.constant 0 : i32
    %c0_i32_0 = arith.constant 0 : i32
    %c0_i32_1 = arith.constant 0 : i32
    return %arg1, %arg0, %c0_i32, %c0_i32_0 : i32, i32, i32, i32
  }
  func.func @transform_2(%arg0: i32, %arg1: i32) -> (i32, i32, i32, i32) {
    %c0_i32 = arith.constant 0 : i32
    %c0_i32_0 = arith.constant 0 : i32
    %c0_i32_1 = arith.constant 0 : i32
    return %arg1, %arg0, %c0_i32, %c0_i32_0 : i32, i32, i32, i32
  }
  func.func @transform_3(%arg0: i32, %arg1: i32) -> (i32, i32) {
    %c0_i32 = arith.constant 0 : i32
    %c0_i32_0 = arith.constant 0 : i32
    %c0_i32_1 = arith.constant 0 : i32
    return %c0_i32, %c0_i32_0 : i32, i32
  }
  func.func @transform_4(%arg0: i32, %arg1: i32) -> (i32, i32) {
    %c0_i32 = arith.constant 0 : i32
    %c0_i32_0 = arith.constant 0 : i32
    %c0_i32_1 = arith.constant 0 : i32
    return %c0_i32, %c0_i32_0 : i32, i32
  }
  func.func @transform_5(%arg0: i32, %arg1: i32) -> (i32, i32) {
    %c0_i32 = arith.constant 0 : i32
    %c0_i32_0 = arith.constant 0 : i32
    %c0_i32_1 = arith.constant 0 : i32
    return %c0_i32, %c0_i32_0 : i32, i32
  }
  func.func @transform_6(%arg0: i32, %arg1: i32) -> (i32, i32) {
    %c0_i32 = arith.constant 0 : i32
    %c0_i32_0 = arith.constant 0 : i32
    %c0_i32_1 = arith.constant 0 : i32
    return %c0_i32, %c0_i32_0 : i32, i32
  }
  func.func @transform_7(%arg0: i32, %arg1: i32) -> (i32, i32, i32) {
    %c0_i32 = arith.constant 0 : i32
    %c0_i32_0 = arith.constant 0 : i32
    %c0_i32_1 = arith.constant 0 : i32
    return %arg0, %c0_i32, %c0_i32_0 : i32, i32, i32
  }
}

</mosaic_0001>

<bundles_post_ra>
// kernel: tpu_custom_call.1
= control target key start
LH: loop header
LB: loop body
LE: loop exit
PB: predicated region body
PF: predicated region fallthrough
CT: control target
= control target key end

     0   :  { %s3850_s0 = inlined_call_operand.hbm [shape: f32[2,32,64], index: 0, kind: input, shape index: {}]   ;;  %s3851_s1 = inlined_call_operand.hbm [shape: bf16[4,2,32,64], index: 1, kind: input, shape index: {}]   ;;  %s3852_s2 = inlined_call_operand.hbm [shape: bf16[4,2,16,64], index: 2, kind: input, shape index: {}]   ;;  %s3853_s3 = inlined_call_operand.vmem [shape: bf16[16,32], index: 3, kind: input, shape index: {}]   ;;  %s3854_s4 = inlined_call_operand.vmem [shape: f32[16,1], index: 4, kind: input, shape index: {}]   ;;  %s3855_s5 = inlined_call_operand.vmem [shape: bf16[16,32], index: 5, kind: input, shape index: {}]   ;;  %s3856_s6 = inlined_call_operand.vmem [shape: f32[16,1], index: 6, kind: input, shape index: {}]   ;;  %s3857_s7 = inlined_call_operand.hbm [shape: f32[2,16,64], index: 7, kind: output, shape index: {}]  }
   0x1   :  { %3864 = sst [smem:[#allocation26_spill]] %s3850_s0 }
   0x2   :  { %12 = vsyncpa [#allocation7], 0 }
   0x3   :  { %14 = vsyncpa [#allocation7 + $0x1], 0 }
   0x4   :  { %15 = vsyncpa [#allocation10], 0 }
   0x5   :  { %17 = vsyncpa [#allocation10 + $0x1], 0 }
   0x6   :  { %18 = vsyncpa [#allocation8], 0 }
   0x7   :  { %20 = vsyncpa [#allocation8 + $0x1], 0  ;;  %s3118_s24 = smov 0   ;;  %s3120_s25 = smov 0  }
   0x8   :  { %s3122_s26 = smov 0   ;;  %s3124_s27 = smov 0  }
   0x9   :  { %s3126_s28 = smov 0   ;;  %s3128_s29 = smov 0  }
   0xa LB: > { %3865 = sst [smem:[#allocation22_spill]] %s3043_s26  ;;  %s3149_s30 = sadd.s32 4294967295, %s3055_s29   ;;  %s3055_s29 = sphi %s3128_s29, %s26_s29   ;;  %s3051_s28 = sphi %s3126_s28, %s3885_s28   ;;  %s3047_s27 = sphi %s3124_s27, %s3884_s27   ;;  %s3043_s26 = sphi %s3122_s26, %s3880_s26   ;;  %s3039_s25 = sphi %s3120_s25, %s3883_s25   ;;  %s3035_s24 = sphi %s3118_s24, %s3882_s24  }
   0xb   : > { %s2362_s8 = sadd.s32 4294967294, %s3055_s29   ;;  %s38_s9 = sadd.s32 1, %s3051_s28 }
   0xc   : > { %s45_s10 = sadd.s32 1, %s3043_s26  ;;  %p40_p0 = scmp.ge.s32.totalorder %s38_s9, 2 }
   0xd   : > { %p52_p1 = scmp.ne.s32.totalorder %s3043_s26, %s3039_s25  ;;  %p53_p2 = scmp.eq.s32.totalorder %s3055_s29, 0 }
   0xe   : > { %p58_p3 = scmp.ne.s32.totalorder %s3039_s25, %s3035_s24  ;;  %s3887_s9 = smov (%p40_p0, %s38_s9), 0 }
   0xf   : > { %3866 = sst [smem:[#allocation23_spill]] %s3887_s9  ;;  %p3161_p4 = por %p53_p2, %p52_p1 }
  0x10   : > { %p59_p5 = scmp.eq.s32.totalorder %s3149_s30, 0  ;;  %s42_s12 = ssub.s32 %s3051_s28, %s3887_s9 }
  0x11   : > { %p222_p6 = scmp.eq.s32.totalorder %s3149_s30, 1  ;;  %p43_p7 = scmp.eq.s32.totalorder %s42_s12, 0 }
  0x12   : > { %p3169_p8 = por %p59_p5, %p58_p3  ;;  %p228_p10 = scmp.eq.s32.totalorder %s2362_s8, 1 }
  0x13   : > { %p3173_p9 = por %p222_p6, %p52_p1  ;;  %p3859_p12 = scmp.ge.s32.totalorder %s3055_s29, 2 }
  0x14   : > { %s3178_s15 = scalar_select %p43_p7, %s3043_s26, %s45_s10  }
  0x15   : > { %s3869_s14 = scalar_select %p3173_p9, 1, 0 }
  0x16   : > { %3870 = sst [smem:[#allocation24_spill]] %s3178_s15  ;;  %p3180_p11 = por %p228_p10, %p58_p3 }
  0x17   : > { %256 = sbr.rel (%p3859_p12) target bundleno = 82 (0x52), region = 32  ;;  %s3188_s17 = sand.u32 (!%p3859_p12), 1, %s3043_s26  }
  0x18   : > { %s3871_s16 = scalar_select %p3180_p11, 1, 0 }
  0x19   : > { %s2456_s18 = sshll.u32 (!%p3859_p12), %s3051_s28, 9  ;;  %s3861_s19 = sshll.u32 (!%p3859_p12), %s3188_s17, 5 }
  0x1a   : > { %3872 = sst [smem:[#allocation25_spill]] %s3871_s16  ;;  %s3873_s0 = sld [smem:[#allocation26_spill]] (!%p3859_p12) }
  0x1b   : > { %s264_s23 = scalar_lea.vmem (!%p3859_p12), [#allocation6], %s3861_s19  ;;  %s261_s10 = scalar_lea.sflag (!%p3859_p12), [#allocation7], %s3188_s17 }
  0x1c   : > { %s271_s8 = sshll.u32 (!%p3859_p12), %s264_s23, 4  ;;  %s3199_s8 = int_to_ptr.vmem [resolvable:$true] %s271_s8 }
  0x20   : > { %s3195_s22 = scalar_lea.hbm %s3873_s0, %s2456_s18  ;;  %s2945_s18 = scalar_lea.hbm %s3873_s0, 1024 }
  0x21   : > { %s2941_s12 = scalar_lea.hbm %s3195_s22, 512  ;;  %p2946_p2 = scmp.lt.u32.totalorder %s3195_s22, %s3873_s0 }
  0x22   : > { %p2942_p13 = scmp.ne.s32.totalorder %s3195_s22, %s2941_s12  ;;  %p2947_p3 = scmp.lt.u32.totalorder %s2945_s18, %s2941_s12 }
  0x23   : > { %p2949_p6 = scmp.lt.u32.totalorder %s2941_s12, %s3195_s22 }
  0x24   : > { %p2943_p0 = pnand %p2942_p13, %p3161_p4  ;;  %p2948_p5 = por %p2947_p3, %p2946_p2 }
  0x26   : > { %p2944_p1 = pneg %p2943_p0  ;;  %p2950_p7 = por %p2949_p6, %p2948_p5 }
  0x28   : > { %p2951_p10 = pnand %p2950_p7, %p2944_p1 }
  0x2a   : > { %2954 = shalt.err (!%p2951_p10)
}
  0x2b   : > { %s2955_s23 = scalar_lea.vmem %s3199_s8, 512  ;;  %s3057_s9 = smov [#allocation6]  }
  0x2c   : > { %p2956_p13 = scmp.ne.s32.totalorder %s3199_s8, %s2955_s23  ;;  %s2959_s15 = sshll.u32 %s3057_s9, 4  ;;  %s2960_s15 = int_to_ptr.vmem [resolvable:$false] %s2959_s15 }
  0x2d   : > { %s2961_s20 = scalar_lea.vmem %s2960_s15, 1024  ;;  %p2962_p11 = scmp.lt.s32.totalorder %s3199_s8, %s2960_s15 }
  0x2e   : > { %p2957_p0 = pnand %p2956_p13, %p3161_p4  ;;  %p2963_p9 = scmp.lt.s32.totalorder %s2961_s20, %s2955_s23 }
  0x30   : > { %p2958_p12 = pneg %p2957_p0  ;;  %p2964_p2 = por %p2963_p9, %p2962_p11 }
  0x32   : > { %p2965_p3 = pnand %p2964_p2, %p2958_p12 }
  0x34   : > { %2968 = shalt.err (!%p2965_p3)
}
  0x35   : > { %s3058_s12 = smov 128   ;;  %s3059_s18 = smov 8  }
  0x36   : > { %2703 = dma.hbm_to_vmem [thread:$0]  (%p3161_p4), %s3195_s22, 512, %s3199_s8, %s261_s10, %s3058_s12, %s3058_s12, %s3059_s18  }
  0x37   : > { %s281_s21 = sand.u32 1, %s3055_s29   ;;  %s2368_s23 = sshll.u32 %s3188_s17, 6 }
  0x38   : > { %s2457_s9 = sshll.u32 %s3051_s28, 8  ;;  %s285_s15 = scalar_lea.vmem [#allocation9], %s2368_s23 }
  0x39   : > { %s307_s20 = sshll.u32 %s285_s15, 4  ;;  %s3060_s26 = smov 512   ;;  %s308_s20 = int_to_ptr.vmem [resolvable:$true] %s307_s20 }
  0x3a   : > { %s2704_s19 = scalar_select %p3161_p4, [#allocation0], [#allocation17] }
  0x3b   : > { %2705 = sst [smem:[#allocation14]] (%p3161_p4), %s3060_s26  ;;  %s3061_s22 = smov 256  }
  0x3c   : > { %s299_s0 = sld [smem:[%s2704_s19]]   ;;  %s3062_s8 = smov 4  }
  0x3d   : > { %2706 = sst [smem:[#allocation14 + $0x1]] (%p3161_p4), %s3061_s22  ;;  %s294_s18 = scalar_lea.hbm %s3851_s1, %s2457_s9 }
  0x3e   : > { %2707 = sst [smem:[#allocation14 + $0x2]] (%p3161_p4), %s3062_s8  ;;  %s3063_s16 = smov 64  }
  0x3f   : > { %2708 = sst [smem:[#allocation14 + $0x3]] (%p3161_p4), %s3063_s16  ;;  %s282_s23 = scalar_lea.sflag [#allocation10], %s281_s21 }
  0x40   : > { %2709 = sst [smem:[#allocation14 + $0x4]] (%p3161_p4), %s3063_s16  ;;  %s3064_s15 = smov [#allocation13]  }
  0x41   : > { %2710 = sst [smem:[#allocation14 + $0x5]] (%p3161_p4), %s3062_s8 }
  0x42   : > { %s2371_s19 = sshll.u32 %s299_s0, 26 }
  0x43   : > { %s2372_s26 = sadd.s32 134217728, %s2371_s19 }
  0x44   : > { %2711 = dma.general (%p3161_p4), %s294_s18, 1024, %s308_s20, %s282_s23, %s3064_s15, [#allocation14], %s2372_s26, 0  }
  0x45   : > { %s2458_s9 = sshll.u32 %s3051_s28, 7  ;;  %s3874_s8 = sshll.u32 %s3188_s17, 5 }
  0x46   : > { %s343_s16 = scalar_lea.hbm %s3852_s2, %s2458_s9  ;;  %s334_s21 = scalar_lea.vmem [#allocation11], %s3874_s8 }
  0x47   : > { %s2712_s0 = scalar_select %p3161_p4, [#allocation0], [#allocation18] }
  0x48   : > { %s356_s12 = sshll.u32 %s334_s21, 4  ;;  %s3065_s18 = smov 256   ;;  %s357_s12 = int_to_ptr.vmem [resolvable:$true] %s356_s12 }
  0x49   : > { %s348_s20 = sld [smem:[%s2712_s0]]   ;;  %s3066_s19 = smov 128  }
  0x4a   : > { %2713 = sst [smem:[#allocation16]] (%p3161_p4), %s3065_s18  ;;  %s3067_s26 = smov 2  }
  0x4b   : > { %2714 = sst [smem:[#allocation16 + $0x1]] (%p3161_p4), %s3066_s19  ;;  %s3068_s15 = smov 64  }
  0x4c   : > { %2715 = sst [smem:[#allocation16 + $0x2]] (%p3161_p4), %s3067_s26  ;;  %s3069_s9 = smov 4  }
  0x4d   : > { %2716 = sst [smem:[#allocation16 + $0x3]] (%p3161_p4), %s3068_s15  ;;  %s3070_s10 = smov [#allocation15]  }
  0x4e   : > { %2717 = sst [smem:[#allocation16 + $0x4]] (%p3161_p4), %s3068_s15 }
  0x4f   : > { %s2376_s17 = sshll.u32 %s348_s20, 26  ;;  %2718 = sst [smem:[#allocation16 + $0x5]] (%p3161_p4), %s3069_s9 }
  0x50   : > { %s2377_s22 = sadd.s32 134217728, %s2376_s17 }
  0x51   : > { %2719 = dma.general (%p3161_p4), %s343_s16, 512, %s357_s12, %s282_s23, %s3070_s10, [#allocation16], %s2377_s22, 0  }
  0x52 PF: > { %p2378_p9 = scmp.ge.s32.totalorder %s3055_s29, 1  ;;  %p377_p11 = scmp.lt.s32.totalorder %s3055_s29, 3 }
  0x54   : > { %p378_p12 = pnand %p2378_p9, %p377_p11 }
  0x55   : > { %s3272_s0 = sand.u32 (!%p378_p12), 1, %s3039_s25  }
  0x56   : > { %381 = sbr.rel (%p378_p12) target bundleno = 3275 (0xccb), region = 48  ;;  %s2379_s8 = sshll.u32 (!%p378_p12), %s3272_s0, 5 }
  0x57   : > { %s384_s21 = scalar_lea.sflag (!%p378_p12), [#allocation7], %s3272_s0  ;;  %s387_s20 = scalar_lea.vmem (!%p378_p12), [#allocation6], %s2379_s8 }
  0x5d   : > { %3022 = dma.done.wait (%p3169_p8), %s384_s21, 512  }
  0x5e   : > { %3024 = vsyncadd (%p3169_p8), %s384_s21, 4294966784  ;;  %s392_s11 = sand.u32 1, %s3149_s30   ;;  %s2380_s23 = sshll.u32 %s3272_s0, 6 }
  0x5f   : > { %s393_s16 = scalar_lea.sflag [#allocation10], %s392_s11  ;;  %s3284_s12 = scalar_lea.vmem [#allocation9], %s2380_s23 }
  0x60   : > { %3026 = dma.done.wait (%p3169_p8), %s393_s16, 1536  }
  0x61   : > { %3028 = vsyncadd (%p3169_p8), %s393_s16, 4294965760  ;;  %v3071_v0 = vmov 0.0   ;;  %vm3072_vm0 = vmmov 0   ;;  %v3073_v1 = vmov 0   ;;  %v3293_v2 = vld [vmem:[%s387_s20] sm:$0xff]  ;;  %v3295_v3 = vld [vmem:[%s387_s20 + $0x8] sm:$0xff] }
  0x62   : > { %2529 = vmatprep.subr.bf16.mxu0 %v3071_v0  ;;  %2533 = vmatprep.mubr.msk.bf16.mxu0 %vm3072_vm0, %v3071_v0  ;;  %v3297_v4 = vld [vmem:[%s387_s20 + $0x10] sm:$0xff]  ;;  %v473_v5 = vpack.c.bf16 %v3295_v3, %v3293_v2  ;;  %v3301_v6 = vld [vmem:[%s387_s20 + $0x18] sm:$0xff]  ;;  %vm492_vm1 = vcmask 261120   ;;  %v476_v8 = vld [vmem:[%s3854_s4 + $0x8] sm:$0xff]  ;;  %vm539_vm2 = vcmask 523264   ;;  %vm570_vm3 = vcmask 130048  }
  0x63   : > { %2797 = vset.pattern.permute.xlu0 %v3073_v1  ;;  %v475_v7 = vld [vmem:[%s3854_s4] sm:$0xff]  ;;  %v3311_v9 = vpack.c.bf16 %v3301_v6, %v3297_v4  ;;  %943 = vst.msk [vmem:[#allocation5] sm:$0xff] %vm539_vm2, %v3071_v0  ;;  %944 = vst.msk [vmem:[#allocation5 + $0x8] sm:$0xff] %vm539_vm2, %v3071_v0  ;;  %vm940_vm4 = vcmask 516096   ;;  %s3582_s11 = scalar_lea.vmem [#allocation11], %s2379_s8  ;;  %s2382_s8 = sshll.u32 %s3272_s0, 4 }
  0x64   : > { %2530 = vmatpush3.bf16.msra.mxu0 %v473_v5  ;;  %479 = vperm.xlu0 %2797, %v475_v7   ;;  %v2799_v10 = vld [vmem:[%s3853_s3] sm:$0xff]   ;;  %942 = vst.msk [vmem:[#allocation4] sm:$0x1] %vm940_vm4, %v3071_v0  ;;  %s2459_s23 = sshll.u32 %s3047_s27, 8  ;;  %s445_s16 = scalar_lea.vmem [#allocation12], %s2382_s8 }
  0x65   : > { %2531 = vmatprep.subr.bf16.mxu0 %v3071_v0  ;;  %s3797_s18 = scalar_lea.hbm %s3857_s7, %s2459_s23  ;;  %s2218_s19 = scalar_lea.sflag [#allocation8], %s3272_s0 }
  0x66   : > { %p3875_p8 = scmp.ne.s32.totalorder %s3869_s14, 0  ;;  %s3075_s26 = smov [#allocation12]  }
  0x67   : > { %s2973_s15 = sshll.u32 %s3075_s26, 4  ;;  %s2974_s15 = int_to_ptr.vmem [resolvable:$false] %s2973_s15 }
  0x68   : > { %2532 = vmatpush3.bf16.msra.mxu0 %v3311_v9  ;;  %484 = vperm.xlu0 %2797, %v476_v8   ;;  %s2975_s17 = scalar_lea.vmem %s2974_s15, 512 }
  0x69   : > { %2559 = vmatprep.subr.bf16.mxu0 %v3071_v0 }
  0x6b   : > { %2534 = vmatmul.mubr.msk.bf16.vlgmr.msra.gmra.mrb[0].mxu0 %vm492_vm1, %v2799_v10 }
  0x6c   : > { %2563 = vmatprep.mubr.msk.bf16.mxu0 %vm3072_vm0, %v3071_v0 }
  0xe3   : > { %v480_v11 = vpop.permute.xlu0 %479 }
  0xe7   : > { %v485_v15 = vpop.permute.xlu0 %484 }
 0x13e   : > { %v530_v12 = vpop.f32.mrb[0].mxu0 }
 0x13f   : > { %v531_v13 = vadd.f32 %v530_v12, %v480_v11  ;;  %v2535_v14 = vpop.f32.mrb[1].mxu0 }
 0x140   : > { %v533_v16 = vpop.f32.mrb[2].mxu0 }
 0x141   : > { %v537_v17 = vmul.f32 %v531_v13, %v531_v13  ;;  %v534_v18 = vadd.f32 %v533_v16, %v485_v15  ;;  %v2536_v19 = vpop.f32.mrb[3].mxu0 }
 0x143   : > { %v538_v20 = vmul.f32 %v534_v18, %v534_v18  ;;  %v540_v21 = vsel %vm539_vm2, %v537_v17, 0.0 }
 0x145   : > { %v541_v22 = vsel %vm539_vm2, %v538_v20, 0.0 }
 0x146   : > { %v542_v23 = vadd.f32 %v541_v22, %v540_v21 }
 0x148   : > { %v543_v24 = vrot.slane %v542_v23, 4 }
 0x14a   : > { %v544_v25 = vadd.f32 %v543_v24, %v542_v23 }
 0x14c   : > { %v545_v26 = vrot.slane %v544_v25, 2 }
 0x14e   : > { %v546_v27 = vadd.f32 %v545_v26, %v544_v25 }
 0x150   : > { %v547_v28 = vrot.slane %v546_v27, 1 }
 0x152   : > { %v548_v29 = vadd.f32 %v547_v28, %v546_v27 }
 0x154   : > { %v549_v30 = vmax.f32 %v548_v29, 1e-24 }
 0x156   : > { %2813 = vrsqrt.f32 %v549_v30 }
 0x160   : > { %v2814_v31 = vpop.eup %2813 }
 0x161   : > { %v552_v32 = vmul.f32 %v2814_v31, %v534_v18  ;;  %v551_v33 = vmul.f32 %v2814_v31, %v531_v13 }
 0x163   : > { %v553_v34 = vpack.c.bf16 %v552_v32, %v551_v33 }
 0x165   : > { %554 = vxpose.xlu1.c.b16.start.end [1/1] (short) (narrow) %v553_v34, 64  ;;  %2537 = vmatprep.subr.bf16.mxu1 %v553_v34 }
 0x166   : > { %2538 = vmatpush3.bf16.msra.mxu1 %v553_v34 }
 0x169   : > { %2798 = vset.pattern.permute.xlu1 %v3073_v1 }
 0x1cb   : > { %v562_v35 = vpop.trf.xlu1 }
 0x1cc   : > { %2539 = vmatprep.mubr.msk.bf16.mxu1 %vm570_vm3, %v562_v35 }
 0x1cf   : > { %v563_v36 = vpop.trf.xlu1 }
 0x1d0   : > { %2540 = vmatmul.mubr.msk.bf16.vlgmr.msra.gmra.mrb[0].mxu1 %vm570_vm3, %v563_v36 }
 0x1d3   : > { %v564_v37 = vpop.trf.xlu1 }
 0x1d4   : > { %2543 = vmatprep.mubr.msk.bf16.mxu1 %vm570_vm3, %v564_v37 }
 0x1d7   : > { %v565_v38 = vpop.trf.xlu1 }
 0x1d8   : > { %2544 = vmatmul.mubr.msk.bf16.gmra.mrb[4].mxu1 %vm570_vm3, %v565_v38 }
 0x1d9   : > { %2555 = vmatprep.mubr.msk.bf16.mxu1 %vm539_vm2, %v473_v5 }
 0x2a3   : > { %v2541_v39 = vpop.f32.mrb[0].mxu1 }
 0x2a4   : > { %v617_v40 = vpop.f32.mrb[1].mxu1  ;;  %v650_v44 = vmul.f32 30.0, %v2541_v39 }
 0x2a5   : > { %v648_v41 = vmul.f32 30.0, %v617_v40  ;;  %v2542_v42 = vpop.f32.mrb[2].mxu1 }
 0x2a6   : > { %v620_v43 = vpop.f32.mrb[3].mxu1  ;;  %v651_v48 = vmul.f32 30.0, %v2542_v42  ;;  %v662_v50 = vsel %vm539_vm2, %v650_v44, -inf }
 0x2a7   : > { %v649_v45 = vmul.f32 30.0, %v620_v43  ;;  %v656_v46 = vsel %vm539_vm2, %v648_v41, -inf }
 0x2a8   : > { %657 = vmax.xlane.f32.xlu1 %v656_v46  ;;  %v665_v57 = vsel %vm539_vm2, %v651_v48, -inf }
 0x2a9   : > { %v659_v47 = vsel %vm539_vm2, %v649_v45, -inf }
 0x2aa   : > { %660 = vmax.xlane.f32.xlu0 %v659_v47 }
 0x2ab   : > { %v2545_v49 = vpop.f32.mrb[4].mxu1 }
 0x2ac   : > { %663 = vmax.xlane.f32.xlu1 %v662_v50  ;;  %v633_v51 = vpop.f32.mrb[5].mxu1  ;;  %v654_v58 = vmul.f32 30.0, %v2545_v49 }
 0x2ad   : > { %v652_v52 = vmul.f32 30.0, %v633_v51  ;;  %v2546_v53 = vpop.f32.mrb[6].mxu1 }
 0x2ae   : > { %v636_v54 = vpop.f32.mrb[7].mxu1  ;;  %v655_v55 = vmul.f32 30.0, %v2546_v53  ;;  %v674_v62 = vsel %vm539_vm2, %v654_v58, -inf }
 0x2af   : > { %v653_v56 = vmul.f32 30.0, %v636_v54  ;;  %v668_v60 = vsel %vm539_vm2, %v652_v52, -inf }
 0x2b0   : > { %666 = vmax.xlane.f32.xlu1 %v665_v57  ;;  %v677_v61 = vsel %vm539_vm2, %v655_v55, -inf }
 0x2b1   : > { %v671_v59 = vsel %vm539_vm2, %v653_v56, -inf }
 0x2b2   : > { %672 = vmax.xlane.f32.xlu0 %v671_v59 }
 0x2b4   : > { %669 = vmax.xlane.f32.xlu1 %v668_v60 }
 0x2b6   : > { %678 = vmax.xlane.f32.xlu0 %v677_v61 }
 0x2b8   : > { %675 = vmax.xlane.f32.xlu1 %v674_v62 }
 0x335   : > { %v658_v63 = vpop.xlane.xlu1 %657 }
 0x336   : > { %v680_v1 = vsub.f32 %v648_v41, %v658_v63 }
 0x337   : > { %v661_v5 = vpop.xlane.xlu0 %660 }
 0x338   : > { %v688_v7 = vmul.f32 1.442695, %v680_v1  ;;  %v681_v8 = vsub.f32 %v649_v45, %v661_v5 }
 0x339   : > { %v664_v10 = vpop.xlane.xlu1 %663 }
 0x33a   : > { %2815 = vpow2.f32 %v688_v7  ;;  %v690_v11 = vmul.f32 1.442695, %v681_v8  ;;  %v682_v12 = vsub.f32 %v650_v44, %v664_v10 }
 0x33c   : > { %2817 = vpow2.f32 %v690_v11  ;;  %v692_v13 = vmul.f32 1.442695, %v682_v12 }
 0x33d   : > { %v667_v14 = vpop.xlane.xlu1 %666 }
 0x33e   : > { %2819 = vpow2.f32 %v692_v13  ;;  %v683_v15 = vsub.f32 %v651_v48, %v667_v14 }
 0x33f   : > { %v673_v16 = vpop.xlane.xlu0 %672 }
 0x340   : > { %v694_v17 = vmul.f32 1.442695, %v683_v15  ;;  %v685_v18 = vsub.f32 %v653_v56, %v673_v16 }
 0x341   : > { %v670_v19 = vpop.xlane.xlu1 %669 }
 0x342   : > { %2821 = vpow2.f32 %v694_v17  ;;  %v698_v20 = vmul.f32 1.442695, %v685_v18  ;;  %v684_v21 = vsub.f32 %v652_v52, %v670_v19  ;;  %v2800_v19 = vld [vmem:[%s3284_s12 + $0x20] sm:$0xff]  }
 0x343   : > { %v679_v22 = vpop.xlane.xlu0 %678 }
 0x344   : > { %v2816_v23 = vpop.eup %2815  ;;  %2823 = vpow2.f32 %v698_v20  ;;  %v696_v24 = vmul.f32 1.442695, %v684_v21  ;;  %v687_v25 = vsub.f32 %v655_v55, %v679_v22  ;;  %v2801_v20 = vld [vmem:[%s3284_s12 + $0x28] sm:$0xff]   ;;  %v3368_v21 = vld [vmem:[%s3855_s5] sm:$0xff]  }
 0x345   : > { %v676_v26 = vpop.xlane.xlu1 %675  ;;  %v704_v27 = vsel %vm539_vm2, %v2816_v23, 0.0 }
 0x346   : > { %v2818_v28 = vpop.eup %2817  ;;  %2825 = vpow2.f32 %v696_v24  ;;  %v702_v29 = vmul.f32 1.442695, %v687_v25  ;;  %v686_v30 = vsub.f32 %v654_v58, %v676_v26  ;;  %705 = vadd.xlane.f32.xlu1 %v704_v27 }
 0x347   : > { %v707_v31 = vsel %vm539_vm2, %v2818_v28, 0.0 }
 0x348   : > { %v2820_v32 = vpop.eup %2819  ;;  %2827 = vpow2.f32 %v702_v29  ;;  %v700_v33 = vmul.f32 1.442695, %v686_v30  ;;  %708 = vadd.xlane.f32.xlu0 %v707_v31 }
 0x349   : > { %v710_v34 = vsel %vm539_vm2, %v2820_v32, 0.0 }
 0x34a   : > { %2829 = vpow2.f32 %v700_v33  ;;  %711 = vadd.xlane.f32.xlu1 %v710_v34 }
 0x34c   : > { %v2822_v35 = vpop.eup %2821 }
 0x34d   : > { %v713_v36 = vsel %vm539_vm2, %v2822_v35, 0.0 }
 0x34e   : > { %v2824_v37 = vpop.eup %2823  ;;  %714 = vadd.xlane.f32.xlu0 %v713_v36 }
 0x34f   : > { %v719_v40 = vsel %vm539_vm2, %v2824_v37, 0.0 }
 0x350   : > { %v2826_v38 = vpop.eup %2825 }
 0x351   : > { %v716_v39 = vsel %vm539_vm2, %v2826_v38, 0.0 }
 0x352   : > { %v2828_v41 = vpop.eup %2827  ;;  %717 = vadd.xlane.f32.xlu1 %v716_v39  ;;  %720 = vadd.xlane.f32.xlu0 %v719_v40 }
 0x353   : > { %v725_v44 = vsel %vm539_vm2, %v2828_v41, 0.0 }
 0x354   : > { %v2830_v42 = vpop.eup %2829 }
 0x355   : > { %v722_v43 = vsel %vm539_vm2, %v2830_v42, 0.0 }
 0x356   : > { %723 = vadd.xlane.f32.xlu1 %v722_v43  ;;  %726 = vadd.xlane.f32.xlu0 %v725_v44 }
 0x3d3   : > { %v706_v45 = vpop.xlane.xlu1 %705 }
 0x3d4   : > { %2831 = vrcp.f32 %v706_v45 }
 0x3d5   : > { %v709_v46 = vpop.xlane.xlu0 %708 }
 0x3d6   : > { %2833 = vrcp.f32 %v709_v46 }
 0x3d7   : > { %v712_v47 = vpop.xlane.xlu1 %711 }
 0x3d8   : > { %2835 = vrcp.f32 %v712_v47 }
 0x3db   : > { %v715_v48 = vpop.xlane.xlu0 %714 }
 0x3dc   : > { %2837 = vrcp.f32 %v715_v48 }
 0x3de   : > { %v2832_v49 = vpop.eup %2831 }
 0x3df   : > { %v718_v50 = vpop.xlane.xlu1 %717  ;;  %v721_v51 = vpop.xlane.xlu0 %720  ;;  %v729_v53 = vmul.f32 %v2832_v49, %v2816_v23  ;;  %v451_v49 = vld [vmem:[%s3856_s6] sm:$0xff] }
 0x3e0   : > { %v2834_v52 = vpop.eup %2833  ;;  %2839 = vrcp.f32 %v718_v50 }
 0x3e1   : > { %2841 = vrcp.f32 %v721_v51  ;;  %v731_v54 = vmul.f32 %v2834_v52, %v2818_v28  ;;  %v452_v51 = vld [vmem:[%s3856_s6 + $0x8] sm:$0xff] }
 0x3e2   : > { %v2836_v58 = vpop.eup %2835 }
 0x3e3   : > { %v724_v55 = vpop.xlane.xlu1 %723  ;;  %v727_v56 = vpop.xlane.xlu0 %726  ;;  %v744_v57 = vpack.c.bf16 %v731_v54, %v729_v53  ;;  %v733_v61 = vmul.f32 %v2836_v58, %v2820_v32 }
 0x3e4   : > { %2843 = vrcp.f32 %v724_v55 }
 0x3e5   : > { %2845 = vrcp.f32 %v727_v56  ;;  %2699 = vmatprep.subr.msk.bf16.mxu1 %vm539_vm2, %v744_v57  ;;  %v755_v59 = vsel %vm539_vm2, %v744_v57, 0 }
 0x3e6   : > { %v2838_v60 = vpop.eup %2837  ;;  %2548 = vmatpush3.bf16.xpose.msra.mxu1 %v755_v59 }
 0x3e7   : > { %v735_v62 = vmul.f32 %v2838_v60, %v2822_v35 }
 0x3e9   : > { %v745_v63 = vpack.c.bf16 %v735_v62, %v733_v61 }
 0x3ea   : > { %v2840_v1 = vpop.eup %2839 }
 0x3eb   : > { %v2842_v5 = vpop.eup %2841  ;;  %2700 = vmatprep.subr.msk.bf16.mxu1 %vm539_vm2, %v745_v63  ;;  %v737_v7 = vmul.f32 %v2840_v1, %v2826_v38  ;;  %v758_v10 = vsel %vm539_vm2, %v745_v63, 0 }
 0x3ec   : > { %v739_v8 = vmul.f32 %v2842_v5, %v2824_v37 }
 0x3ee   : > { %v2844_v11 = vpop.eup %2843  ;;  %2550 = vmatpush3.bf16.xpose.msra.mxu1 %v758_v10  ;;  %v746_v12 = vpack.c.bf16 %v739_v8, %v737_v7 }
 0x3ef   : > { %v2846_v13 = vpop.eup %2845  ;;  %v741_v14 = vmul.f32 %v2844_v11, %v2830_v42 }
 0x3f0   : > { %2701 = vmatprep.subr.msk.bf16.mxu1 %vm539_vm2, %v746_v12  ;;  %v743_v15 = vmul.f32 %v2846_v13, %v2828_v41  ;;  %v761_v16 = vsel %vm539_vm2, %v746_v12, 0 }
 0x3f2   : > { %v747_v17 = vpack.c.bf16 %v743_v15, %v741_v14 }
 0x3f4   : > { %v764_v18 = vsel %vm539_vm2, %v747_v17, 0 }
 0x3f6   : > { %2552 = vmatpush3.bf16.xpose.msra.mxu1 %v761_v16 }
 0x3f7   : > { %2702 = vmatprep.subr.msk.bf16.mxu1 %vm539_vm2, %v747_v17 }
 0x3fe   : > { %2554 = vmatpush3.bf16.xpose.msra.mxu1 %v764_v18 }
 0x3ff   : > { %2603 = vmatprep.subr.bf16.mxu1 %v3071_v0 }
 0x405   : > { %2556 = vmatmul.mubr.msk.bf16.vlgmr.msra.gmra.mrb[8].mxu1 %vm539_vm2, %v3311_v9 }
 0x406   : > { %2607 = vmatprep.mubr.msk.bf16.mxu1 %vm3072_vm0, %v3071_v0  ;;  %2604 = vmatpush3.bf16.msra.mxu1 %v2800_v19 }
 0x407   : > { %2605 = vmatprep.subr.bf16.mxu1 %v3071_v0 }
 0x40a   : > { %2606 = vmatpush3.bf16.msra.mxu1 %v2801_v20 }
 0x40d   : > { %2608 = vmatmul.mubr.msk.bf16.vlgmr.msra.gmra.mrb[12].mxu1 %vm492_vm1, %v3368_v21 }
 0x4d8   : > { %v2557_v22 = vpop.f32.mrb[8].mxu1 }
 0x4d9   : > { %v800_v23 = vpop.f32.mrb[9].mxu1  ;;  %v817_v26 = vadd.f32 %v2557_v22, %v3297_v4 }
 0x4da   : > { %v815_v9 = vadd.f32 %v800_v23, %v3293_v2  ;;  %v2558_v24 = vpop.f32.mrb[10].mxu1 }
 0x4db   : > { %v803_v25 = vpop.f32.mrb[11].mxu1  ;;  %v818_v29 = vadd.f32 %v2558_v24, %v3301_v6  ;;  %v825_v31 = vsel %vm539_vm2, %v817_v26, 0.0 }
 0x4dc   : > { %v816_v27 = vadd.f32 %v803_v25, %v3295_v3  ;;  %v819_v28 = vsel %vm539_vm2, %v815_v9, 0.0 }
 0x4dd   : > { %820 = vadd.xlane.f32.xlu1 %v819_v28  ;;  %v828_v32 = vsel %vm539_vm2, %v818_v29, 0.0 }
 0x4de   : > { %v822_v30 = vsel %vm539_vm2, %v816_v27, 0.0 }
 0x4df   : > { %823 = vadd.xlane.f32.xlu0 %v822_v30 }
 0x4e0   : > { %v1359_v50 = vpop.f32.mrb[12].mxu1 }
 0x4e1   : > { %826 = vadd.xlane.f32.xlu1 %v825_v31  ;;  %v2609_v52 = vpop.f32.mrb[13].mxu1  ;;  %v2803_v31 = vld [vmem:[%s3284_s12] sm:$0xff]  }
 0x4e2   : > { %v1362_v53 = vpop.f32.mrb[14].mxu1 }
 0x4e3   : > { %829 = vadd.xlane.f32.xlu0 %v828_v32  ;;  %v2610_v54 = vpop.f32.mrb[15].mxu1 }
 0x56a   : > { %v821_v2 = vpop.xlane.xlu1 %820 }
 0x56b   : > { %v832_v33 = vmul.f32 0.015625, %v821_v2 }
 0x56c   : > { %v824_v34 = vpop.xlane.xlu0 %823 }
 0x56d   : > { %v836_v4 = vsub.f32 %v815_v9, %v832_v33  ;;  %v833_v35 = vmul.f32 0.015625, %v824_v34  ;;  %v2804_v33 = vld [vmem:[%s3284_s12 + $0x8] sm:$0xff]  }
 0x56e   : > { %v827_v3 = vpop.xlane.xlu1 %826 }
 0x56f   : > { %v837_v36 = vsub.f32 %v816_v27, %v833_v35  ;;  %v834_v37 = vmul.f32 0.015625, %v827_v3  ;;  %v840_v38 = vmul.f32 %v836_v4, %v836_v4 }
 0x570   : > { %v830_v39 = vpop.xlane.xlu0 %829 }
 0x571   : > { %v838_v6 = vsub.f32 %v817_v26, %v834_v37  ;;  %v835_v40 = vmul.f32 0.015625, %v830_v39  ;;  %v844_v41 = vsel %vm539_vm2, %v840_v38, 0.0  ;;  %v841_v42 = vmul.f32 %v837_v36, %v837_v36 }
 0x572   : > { %845 = vadd.xlane.f32.xlu1 %v844_v41 }
 0x573   : > { %v839_v43 = vsub.f32 %v818_v29, %v835_v40  ;;  %v847_v44 = vsel %vm539_vm2, %v841_v42, 0.0  ;;  %v842_v45 = vmul.f32 %v838_v6, %v838_v6 }
 0x574   : > { %848 = vadd.xlane.f32.xlu0 %v847_v44 }
 0x575   : > { %v850_v46 = vsel %vm539_vm2, %v842_v45, 0.0  ;;  %v843_v47 = vmul.f32 %v839_v43, %v839_v43 }
 0x576   : > { %851 = vadd.xlane.f32.xlu1 %v850_v46 }
 0x577   : > { %v853_v48 = vsel %vm539_vm2, %v843_v47, 0.0 }
 0x578   : > { %854 = vadd.xlane.f32.xlu0 %v853_v48 }
 0x587   : > { %455 = vperm.xlu1 %2798, %v451_v49  }
 0x58e   : > { %460 = vperm.xlu0 %2797, %v452_v51  }
 0x5ff   : > { %v846_v55 = vpop.xlane.xlu1 %845 }
 0x600   : > { %v856_v56 = vmul.f32 0.015625, %v846_v55 }
 0x601   : > { %v849_v57 = vpop.xlane.xlu0 %848 }
 0x602   : > { %v860_v58 = vadd.f32 1e-05, %v856_v56  ;;  %v857_v59 = vmul.f32 0.015625, %v849_v57 }
 0x603   : > { %v852_v60 = vpop.xlane.xlu1 %851 }
 0x604   : > { %2847 = vrsqrt.f32 %v860_v58  ;;  %v861_v61 = vadd.f32 1e-05, %v857_v59  ;;  %v858_v62 = vmul.f32 0.015625, %v852_v60 }
 0x605   : > { %v855_v63 = vpop.xlane.xlu0 %854 }
 0x606   : > { %2849 = vrsqrt.f32 %v861_v61  ;;  %v862_v1 = vadd.f32 1e-05, %v858_v62  ;;  %v859_v5 = vmul.f32 0.015625, %v855_v63 }
 0x607   : > { %v3390_v7 = vpop.permute.xlu1 %455 }
 0x608   : > { %2851 = vrsqrt.f32 %v862_v1  ;;  %v863_v8 = vadd.f32 1e-05, %v859_v5  ;;  %v1360_v10 = vadd.f32 %v1359_v50, %v3390_v7 }
 0x60a   : > { %2853 = vrsqrt.f32 %v863_v8  ;;  %v1366_v11 = vmul.f32 %v1360_v10, %v1360_v10 }
 0x60c   : > { %v1368_v17 = vsel %vm539_vm2, %v1366_v11, 0.0 }
 0x60d   : > { %v3393_v12 = vpop.permute.xlu0 %460 }
 0x60e   : > { %v2848_v13 = vpop.eup %2847  ;;  %v1363_v14 = vadd.f32 %v1362_v53, %v3393_v12 }
 0x60f   : > { %v868_v18 = vmul.f32 %v2848_v13, %v836_v4 }
 0x610   : > { %v2850_v15 = vpop.eup %2849  ;;  %v1367_v16 = vmul.f32 %v1363_v14, %v1363_v14 }
 0x611   : > { %v869_v19 = vmul.f32 %v2850_v15, %v837_v36 }
 0x612   : > { %v2852_v20 = vpop.eup %2851  ;;  %v1369_v22 = vsel %vm539_vm2, %v1367_v16, 0.0 }
 0x613   : > { %v1370_v23 = vadd.f32 %v1369_v22, %v1368_v17  ;;  %v872_v9 = vpack.c.bf16 %v869_v19, %v868_v18  ;;  %v870_v26 = vmul.f32 %v2852_v20, %v838_v6 }
 0x614   : > { %v2854_v24 = vpop.eup %2853 }
 0x615   : > { %v1371_v25 = vrot.slane %v1370_v23, 4  ;;  %2560 = vmatpush3.bf16.msra.mxu0 %v872_v9  ;;  %v871_v27 = vmul.f32 %v2854_v24, %v839_v43 }
 0x616   : > { %2561 = vmatprep.subr.bf16.mxu0 %v3071_v0 }
 0x617   : > { %v1372_v28 = vadd.f32 %v1371_v25, %v1370_v23  ;;  %v873_v29 = vpack.c.bf16 %v871_v27, %v870_v26 }
 0x619   : > { %v1373_v30 = vrot.slane %v1372_v28, 2  ;;  %2562 = vmatpush3.bf16.msra.mxu0 %v873_v29 }
 0x61a   : > { %2567 = vmatprep.subr.bf16.mxu0 %v3071_v0 }
 0x61b   : > { %v1374_v32 = vadd.f32 %v1373_v30, %v1372_v28  ;;  %v2805_v28 = vld [vmem:[%s3284_s12 + $0x10] sm:$0xff]   ;;  %v2806_v30 = vld [vmem:[%s3284_s12 + $0x18] sm:$0xff]  }
 0x61c   : > { %2564 = vmatmul.mubr.msk.bf16.vlgmr.msra.gmra.mrb[4].mxu0 %vm492_vm1, %v3368_v21 }
 0x61d   : > { %v1375_v2 = vrot.slane %v1374_v32, 1  ;;  %2568 = vmatpush3.bf16.msra.mxu0 %v2803_v31  ;;  %2571 = vmatprep.mubr.msk.bf16.mxu0 %vm3072_vm0, %v3071_v0 }
 0x61e   : > { %2569 = vmatprep.subr.bf16.mxu0 %v3071_v0 }
 0x61f   : > { %v1376_v34 = vadd.f32 %v1375_v2, %v1374_v32 }
 0x621   : > { %v1377_v4 = vmax.f32 %v1376_v34, 1e-24  ;;  %2570 = vmatpush3.bf16.msra.mxu0 %v2804_v33 }
 0x623   : > { %2855 = vrsqrt.f32 %v1377_v4 }
 0x624   : > { %2572 = vmatmul.mubr.msk.bf16.vlgmr.msra.gmra.mrb[8].mxu0 %vm492_vm1, %v3368_v21 }
 0x62d   : > { %v2856_v35 = vpop.eup %2855 }
 0x62e   : > { %v1380_v3 = vmul.f32 %v2856_v35, %v1363_v14  ;;  %v1379_v36 = vmul.f32 %v2856_v35, %v1360_v10 }
 0x630   : > { %v1381_v37 = vpack.c.bf16 %v1380_v3, %v1379_v36 }
 0x6ef   : > { %v916_v38 = vpop.f32.mrb[4].mxu0 }
 0x6f0   : > { %v917_v39 = vadd.f32 %v916_v38, %v3390_v7  ;;  %v2565_v6 = vpop.f32.mrb[5].mxu0 }
 0x6f1   : > { %v919_v40 = vpop.f32.mrb[6].mxu0 }
 0x6f2   : > { %v923_v41 = vmul.f32 %v917_v39, %v917_v39  ;;  %v920_v42 = vadd.f32 %v919_v40, %v3393_v12  ;;  %v2566_v43 = vpop.f32.mrb[7].mxu0 }
 0x6f4   : > { %v924_v44 = vmul.f32 %v920_v42, %v920_v42  ;;  %v925_v45 = vsel %vm539_vm2, %v923_v41, 0.0 }
 0x6f6   : > { %v926_v46 = vsel %vm539_vm2, %v924_v44, 0.0 }
 0x6f7   : > { %v927_v47 = vadd.f32 %v926_v46, %v925_v45  ;;  %v1007_v48 = vpop.f32.mrb[8].mxu0 }
 0x6f8   : > { %v1008_v49 = vadd.f32 %v1007_v48, %v3390_v7  ;;  %v2573_v50 = vpop.f32.mrb[9].mxu0 }
 0x6f9   : > { %v928_v51 = vrot.slane %v927_v47, 4  ;;  %v1010_v52 = vpop.f32.mrb[10].mxu0 }
 0x6fa   : > { %v1014_v53 = vmul.f32 %v1008_v49, %v1008_v49  ;;  %v1011_v54 = vadd.f32 %v1010_v52, %v3393_v12  ;;  %v2574_v55 = vpop.f32.mrb[11].mxu0 }
 0x6fb   : > { %v929_v56 = vadd.f32 %v928_v51, %v927_v47 }
 0x6fc   : > { %v1015_v57 = vmul.f32 %v1011_v54, %v1011_v54  ;;  %v1017_v59 = vsel %vm539_vm2, %v1014_v53, 0.0 }
 0x6fd   : > { %v930_v58 = vrot.slane %v929_v56, 2 }
 0x6fe   : > { %v1018_v60 = vsel %vm539_vm2, %v1015_v57, 0.0 }
 0x6ff   : > { %v931_v61 = vadd.f32 %v930_v58, %v929_v56  ;;  %v1019_v62 = vadd.f32 %v1018_v60, %v1017_v59 }
 0x701   : > { %v932_v63 = vrot.slane %v931_v61, 1  ;;  %v1020_v1 = vrot.slane %v1019_v62, 4 }
 0x703   : > { %v933_v5 = vadd.f32 %v932_v63, %v931_v61  ;;  %v1021_v8 = vadd.f32 %v1020_v1, %v1019_v62 }
 0x705   : > { %v934_v10 = vmax.f32 %v933_v5, 1e-24  ;;  %v1022_v11 = vrot.slane %v1021_v8, 2 }
 0x707   : > { %2857 = vrsqrt.f32 %v934_v10  ;;  %v1023_v13 = vadd.f32 %v1022_v11, %v1021_v8 }
 0x709   : > { %v1024_v14 = vrot.slane %v1023_v13, 1 }
 0x70b   : > { %v1025_v15 = vadd.f32 %v1024_v14, %v1023_v13 }
 0x70d   : > { %v1026_v16 = vmax.f32 %v1025_v15, 1e-24 }
 0x70f   : > { %2859 = vrsqrt.f32 %v1026_v16 }
 0x711   : > { %v2858_v17 = vpop.eup %2857 }
 0x712   : > { %v936_v18 = vmul.f32 %v2858_v17, %v917_v39  ;;  %v937_v19 = vmul.f32 %v2858_v17, %v920_v42 }
 0x714   : > { %938 = vst.msk [vmem:[#allocation2] sm:$0xff] %vm539_vm2, %v936_v18  ;;  %939 = vst.msk [vmem:[#allocation2 + $0x8] sm:$0xff] %vm539_vm2, %v937_v19 }
 0x719   : > { %v2860_v20 = vpop.eup %2859 }
 0x71a   : > { %v1028_v22 = vmul.f32 %v2860_v20, %v1008_v49  ;;  %v1029_v23 = vmul.f32 %v2860_v20, %v1011_v54 }
 0x71b   : > { %v945_v9 = vld [vmem:[#allocation2] sm:$0xff]  ;;  %v946_v24 = vld [vmem:[#allocation2 + $0x8] sm:$0xff] }
 0x71c   : > { %v1030_v25 = vpack.c.bf16 %v1029_v23, %v1028_v22  ;;  %v3419_v26 = vpack.c.bf16 %v946_v24, %v945_v9 }
 0x71e   : > { %2575 = vmatprep.subr.bf16.mxu0 %v3419_v26  ;;  %2611 = vmatprep.subr.bf16.mxu1 %v3419_v26 }
 0x71f   : > { %1031 = vxpose.xlu1.c.b16.start.end [1/1] (short) (narrow) %v1030_v25, 64  ;;  %2576 = vmatpush3.bf16.msra.mxu0 %v3419_v26 }
 0x720   : > { %2612 = vmatpush3.bf16.msra.mxu1 %v3419_v26  ;;  %2585 = vmatprep.subr.bf16.mxu0 %v3071_v0 }
 0x721   : > { %2651 = vmatprep.subr.bf16.mxu1 %v3071_v0 }
 0x72c   : > { %1382 = vxpose.xlu1.c.b16.start.end [1/1] (short) (narrow) %v1381_v37, 64 }
 0x785   : > { %v1039_v27 = vpop.trf.xlu1 }
 0x786   : > { %2577 = vmatprep.mubr.msk.bf16.mxu0 %vm570_vm3, %v1039_v27 }
 0x789   : > { %v1040_v29 = vpop.trf.xlu1 }
 0x78a   : > { %2578 = vmatmul.mubr.msk.bf16.vlgmr.msra.gmra.mrb[12].mxu0 %vm570_vm3, %v1040_v29 }
 0x78b   : > { %2586 = vmatpush3.bf16.msra.mxu0 %v2805_v28 }
 0x78c   : > { %2587 = vmatprep.subr.bf16.mxu0 %v3071_v0 }
 0x78d   : > { %v1041_v31 = vpop.trf.xlu1 }
 0x78e   : > { %2581 = vmatprep.mubr.msk.bf16.mxu0 %vm570_vm3, %v1041_v31 }
 0x78f   : > { %2588 = vmatpush3.bf16.msra.mxu0 %v2806_v30 }
 0x790   : > { %2593 = vmatprep.subr.bf16.mxu0 %v3419_v26 }
 0x791   : > { %v1042_v32 = vpop.trf.xlu1 }
 0x792   : > { %2582 = vmatmul.mubr.msk.bf16.gmra.mrb[16].mxu0 %vm570_vm3, %v1042_v32  ;;  %v2807_v32 = vld [vmem:[%s3284_s12 + $0x30] sm:$0xff]  }
 0x793   : > { %2589 = vmatprep.mubr.msk.bf16.mxu0 %vm3072_vm0, %v3071_v0 }
 0x795   : > { %v1390_v17 = vpop.trf.xlu1 }
 0x796   : > { %2613 = vmatprep.mubr.msk.bf16.mxu1 %vm570_vm3, %v1390_v17 }
 0x799   : > { %v1391_v22 = vpop.trf.xlu1 }
 0x79a   : > { %2590 = vmatmul.mubr.msk.bf16.vlgmr.msra.gmra.mrb[20].mxu0 %vm492_vm1, %v3368_v21  ;;  %2614 = vmatmul.mubr.msk.bf16.vlgmr.msra.gmra.mrb[16].mxu1 %vm570_vm3, %v1391_v22 }
 0x79b   : > { %2594 = vmatpush3.bf16.msra.mxu0 %v3419_v26 }
 0x79c   : > { %2621 = vmatprep.subr.bf16.mxu0 %v3071_v0 }
 0x79d   : > { %v1392_v24 = vpop.trf.xlu1 }
 0x79e   : > { %2617 = vmatprep.mubr.msk.bf16.mxu1 %vm570_vm3, %v1392_v24 }
 0x7a1   : > { %v1393_v25 = vpop.trf.xlu1 }
 0x7a2   : > { %2618 = vmatmul.mubr.msk.bf16.gmra.mrb[20].mxu1 %vm570_vm3, %v1393_v25 }
 0x7a3   : > { %2659 = vmatprep.mubr.msk.bf16.mxu1 %vm3072_vm0, %v3071_v0 }
 0x85d   : > { %v2579_v2 = vpop.f32.mrb[12].mxu0 }
 0x85e   : > { %v1094_v33 = vpop.f32.mrb[13].mxu0  ;;  %v3441_v35 = vmul.f32 30.0, %v2579_v2 }
 0x85f   : > { %v2580_v34 = vpop.f32.mrb[14].mxu0  ;;  %v3443_v3 = vmul.f32 30.0, %v1094_v33  ;;  %v2808_v33 = vld [vmem:[%s3284_s12 + $0x38] sm:$0xff]   ;;  %s2231_s12 = sshll.u32 %s445_s16, 4  ;;  %s3799_s12 = int_to_ptr.vmem [resolvable:$true] %s2231_s12 }
 0x860   : > { %v1097_v4 = vpop.f32.mrb[15].mxu0  ;;  %v3445_v37 = vmul.f32 30.0, %v2580_v34  ;;  %v1660_v42 = vsel %vm539_vm2, %v3441_v35, -inf  ;;  %s2969_s27 = scalar_lea.vmem %s3799_s12, 256  ;;  %p2976_p6 = scmp.lt.s32.totalorder %s3799_s12, %s2974_s15 }
 0x861   : > { %v3449_v6 = vmul.f32 30.0, %v1097_v4  ;;  %v1658_v46 = vsel %vm539_vm2, %v3443_v3, -inf  ;;  %p2970_p4 = scmp.ne.s32.totalorder %s3799_s12, %s2969_s27  ;;  %p2977_p7 = scmp.lt.s32.totalorder %s2975_s17, %s2969_s27 }
 0x862   : > { %v1661_v50 = vsel %vm539_vm2, %v3445_v37, -inf }
 0x863   : > { %v1659_v53 = vsel %vm539_vm2, %v3449_v6, -inf  ;;  %p2971_p1 = pnand %p2970_p4, %p3875_p8  ;;  %p2978_p10 = por %p2977_p7, %p2976_p6 }
 0x865   : > { %v2583_v36 = vpop.f32.mrb[16].mxu0  ;;  %p2972_p5 = pneg %p2971_p1 }
 0x866   : > { %v3447_v38 = vmul.f32 30.0, %v2583_v36  ;;  %v1110_v39 = vpop.f32.mrb[17].mxu0 }
 0x867   : > { %v3451_v40 = vmul.f32 30.0, %v1110_v39  ;;  %v2584_v41 = vpop.f32.mrb[18].mxu0  ;;  %p2979_p13 = pnand %p2978_p10, %p2972_p5 }
 0x868   : > { %v1666_v43 = vsel %vm539_vm2, %v3447_v38, -inf  ;;  %v3457_v44 = vmul.f32 30.0, %v2584_v41  ;;  %v1113_v45 = vpop.f32.mrb[19].mxu0 }
 0x869   : > { %v1667_v47 = vmax.f32 %v1660_v42, %v1666_v43  ;;  %v1662_v48 = vsel %vm539_vm2, %v3451_v40, -inf  ;;  %v3463_v49 = vmul.f32 30.0, %v1113_v45 }
 0x86a   : > { %v1663_v51 = vmax.f32 %v1658_v46, %v1662_v48  ;;  %v1668_v52 = vsel %vm539_vm2, %v3457_v44, -inf }
 0x86b   : > { %v1669_v54 = vmax.f32 %v1661_v50, %v1668_v52  ;;  %v1664_v55 = vsel %vm539_vm2, %v3463_v49, -inf }
 0x86c   : > { %v1665_v56 = vmax.f32 %v1659_v53, %v1664_v55 }
 0x86d   : > { %v1671_v57 = vmax.f32 %v1667_v47, %v1669_v54  ;;  %v1184_v58 = vpop.f32.mrb[20].mxu0  ;;  %v2615_v36 = vpop.f32.mrb[16].mxu1 }
 0x86e   : > { %v1670_v59 = vmax.f32 %v1663_v51, %v1665_v56  ;;  %v1185_v60 = vadd.f32 %v1184_v58, %v3390_v7  ;;  %v2591_v61 = vpop.f32.mrb[21].mxu0  ;;  %v1444_v39 = vpop.f32.mrb[17].mxu1  ;;  %v3499_v42 = vmul.f32 30.0, %v2615_v36 }
 0x86f   : > { %v1187_v62 = vpop.f32.mrb[22].mxu0  ;;  %v2616_v41 = vpop.f32.mrb[18].mxu1  ;;  %v3501_v43 = vmul.f32 30.0, %v1444_v39 }
 0x870   : > { %v3474_v63 = vmax.f32 %v1670_v59, %v1671_v57  ;;  %v1191_v1 = vmul.f32 %v1185_v60, %v1185_v60  ;;  %v1188_v5 = vadd.f32 %v1187_v62, %v3393_v12  ;;  %v2592_v8 = vpop.f32.mrb[23].mxu0  ;;  %v1447_v45 = vpop.f32.mrb[19].mxu1  ;;  %v3503_v47 = vmul.f32 30.0, %v2616_v41 }
 0x871   : > { %v3505_v50 = vmul.f32 30.0, %v1447_v45 }
 0x872   : > { %v1192_v10 = vmul.f32 %v1188_v5, %v1188_v5  ;;  %v1193_v11 = vsel %vm539_vm2, %v1191_v1, 0.0  ;;  %v1704_v53 = vsel %vm539_vm2, %v3503_v47, -inf  ;;  %v1673_v25 = vrot.slane %v3474_v63, 4 }
 0x873   : > { %v1702_v57 = vsel %vm539_vm2, %v3505_v50, -inf }
 0x874   : > { %v1194_v13 = vsel %vm539_vm2, %v1192_v10, 0.0 }
 0x875   : > { %v1195_v14 = vadd.f32 %v1194_v13, %v1193_v11  ;;  %v2619_v46 = vpop.f32.mrb[20].mxu1 }
 0x876   : > { %v1460_v48 = vpop.f32.mrb[21].mxu1  ;;  %v3513_v54 = vmul.f32 30.0, %v2619_v46 }
 0x877   : > { %v1196_v15 = vrot.slane %v1195_v14, 4  ;;  %v2620_v51 = vpop.f32.mrb[22].mxu1  ;;  %v3515_v55 = vmul.f32 30.0, %v1460_v48  ;;  %v1674_v48 = vmax.f32 %v3474_v63, %v1673_v25 }
 0x878   : > { %v1463_v52 = vpop.f32.mrb[23].mxu1  ;;  %v3517_v56 = vmul.f32 30.0, %v2620_v51  ;;  %v1709_v59 = vsel %vm539_vm2, %v3513_v54, -inf }
 0x879   : > { %v1197_v16 = vadd.f32 %v1196_v15, %v1195_v14  ;;  %v3521_v58 = vmul.f32 30.0, %v1463_v52 }
 0x87a   : > { %v1711_v61 = vsel %vm539_vm2, %v3517_v56, -inf }
 0x87b   : > { %v1198_v18 = vrot.slane %v1197_v16, 2  ;;  %v1707_v8 = vsel %vm539_vm2, %v3521_v58, -inf }
 0x87c   : > { %v1708_v10 = vmax.f32 %v1702_v57, %v1707_v8 }
 0x87d   : > { %v1199_v19 = vadd.f32 %v1198_v18, %v1197_v16 }
 0x87f   : > { %v1200_v20 = vrot.slane %v1199_v19, 1 }
 0x881   : > { %v1201_v23 = vadd.f32 %v1200_v20, %v1199_v19 }
 0x883   : > { %v1202_v9 = vmax.f32 %v1201_v23, 1e-24 }
 0x885   : > { %2861 = vrsqrt.f32 %v1202_v9 }
 0x88f   : > { %v2862_v27 = vpop.eup %2861 }
 0x890   : > { %v1205_v28 = vmul.f32 %v2862_v27, %v1188_v5  ;;  %v1204_v29 = vmul.f32 %v2862_v27, %v1185_v60  ;;  %v1705_v60 = vsel %vm539_vm2, %v3515_v55, -inf  ;;  %v1712_v5 = vmax.f32 %v1704_v53, %v1711_v61 }
 0x892   : > { %v1206_v30 = vpack.c.bf16 %v1205_v28, %v1204_v29 }
 0x894   : > { %1207 = vxpose.xlu0.c.b16.start.end [1/1] (short) (narrow) %v1206_v30, 64 }
 0x8fa   : > { %v1215_v31 = vpop.trf.xlu0 }
 0x8fb   : > { %2595 = vmatprep.mubr.msk.bf16.mxu0 %vm570_vm3, %v1215_v31 }
 0x8fe   : > { %v1216_v2 = vpop.trf.xlu0 }
 0x8ff   : > { %2596 = vmatmul.mubr.msk.bf16.vlgmr.msra.gmra.mrb[24].mxu0 %vm570_vm3, %v1216_v2 }
 0x900   : > { %2622 = vmatpush3.bf16.msra.mxu0 %v2807_v32 }
 0x901   : > { %2623 = vmatprep.subr.bf16.mxu0 %v3071_v0 }
 0x902   : > { %v1217_v34 = vpop.trf.xlu0 }
 0x903   : > { %2599 = vmatprep.mubr.msk.bf16.mxu0 %vm570_vm3, %v1217_v34 }
 0x904   : > { %2624 = vmatpush3.bf16.msra.mxu0 %v2808_v33 }
 0x905   : > { %2629 = vmatprep.subr.bf16.mxu0 %v3419_v26 }
 0x906   : > { %v1218_v4 = vpop.trf.xlu0 }
 0x907   : > { %2600 = vmatmul.mubr.msk.bf16.gmra.mrb[28].mxu0 %vm570_vm3, %v1218_v4 }
 0x908   : > { %2625 = vmatprep.mubr.msk.bf16.mxu0 %vm3072_vm0, %v3071_v0 }
 0x90f   : > { %2626 = vmatmul.mubr.msk.bf16.vlgmr.msra.gmra.mrb[32].mxu0 %vm492_vm1, %v3368_v21  ;;  %v1703_v21 = vsel %vm539_vm2, %v3499_v42, -inf }
 0x910   : > { %2630 = vmatpush3.bf16.msra.mxu0 %v3419_v26  ;;  %v1701_v26 = vsel %vm539_vm2, %v3501_v43, -inf  ;;  %v1710_v62 = vmax.f32 %v1703_v21, %v1709_v59 }
 0x911   : > { %2639 = vmatprep.subr.bf16.mxu0 %v3071_v0  ;;  %v1706_v1 = vmax.f32 %v1701_v26, %v1705_v60 }
 0x912   : > { %v1714_v11 = vmax.f32 %v1710_v62, %v1712_v5 }
 0x913   : > { %v1713_v13 = vmax.f32 %v1706_v1, %v1708_v10  ;;  %v1675_v1 = vrot.slane %v1674_v48, 2 }
 0x915   : > { %v1715_v14 = vmax.f32 %v1713_v13, %v1714_v11 }
 0x917   : > { %v1716_v33 = vrot.slane %v1715_v14, 4 }
 0x919   : > { %v1717_v53 = vmax.f32 %v1715_v14, %v1716_v33 }
 0x91b   : > { %v1718_v10 = vrot.slane %v1717_v53, 2 }
 0x9d2   : > { %v2597_v15 = vpop.f32.mrb[24].mxu0 }
 0x9d3   : > { %v1269_v16 = vpop.f32.mrb[25].mxu0  ;;  %v3531_v19 = vmul.f32 30.0, %v2597_v15 }
 0x9d4   : > { %v2598_v17 = vpop.f32.mrb[26].mxu0  ;;  %v3533_v20 = vmul.f32 30.0, %v1269_v16 }
 0x9d5   : > { %v1272_v18 = vpop.f32.mrb[27].mxu0  ;;  %v3535_v23 = vmul.f32 30.0, %v2598_v17  ;;  %v1681_v30 = vsel %vm539_vm2, %v3531_v19, -inf  ;;  %v1676_v17 = vmax.f32 %v1674_v48, %v1675_v1 }
 0x9d6   : > { %v3540_v27 = vmul.f32 30.0, %v1272_v18  ;;  %v1679_v34 = vsel %vm539_vm2, %v3533_v20, -inf }
 0x9d7   : > { %v1682_v41 = vsel %vm539_vm2, %v3535_v23, -inf }
 0x9d8   : > { %v1680_v51 = vsel %vm539_vm2, %v3540_v27, -inf }
 0x9da   : > { %v2601_v22 = vpop.f32.mrb[28].mxu0 }
 0x9db   : > { %v3537_v9 = vmul.f32 30.0, %v2601_v22  ;;  %v1285_v24 = vpop.f32.mrb[29].mxu0  ;;  %v1719_v22 = vmax.f32 %v1717_v53, %v1718_v10 }
 0x9dc   : > { %v3542_v28 = vmul.f32 30.0, %v1285_v24  ;;  %v2602_v29 = vpop.f32.mrb[30].mxu0 }
 0x9dd   : > { %v1687_v31 = vsel %vm539_vm2, %v3537_v9, -inf  ;;  %v3548_v32 = vmul.f32 30.0, %v2602_v29  ;;  %v1288_v2 = vpop.f32.mrb[31].mxu0 }
 0x9de   : > { %v1688_v4 = vmax.f32 %v1681_v30, %v1687_v31  ;;  %v1683_v36 = vsel %vm539_vm2, %v3542_v28, -inf  ;;  %v3554_v39 = vmul.f32 30.0, %v1288_v2  ;;  %v1677_v30 = vrot.slane %v1676_v17, 1 }
 0x9df   : > { %v1684_v45 = vmax.f32 %v1679_v34, %v1683_v36  ;;  %v1689_v46 = vsel %vm539_vm2, %v3548_v32, -inf  ;;  %v1720_v2 = vrot.slane %v1719_v22, 1 }
 0x9e0   : > { %v1690_v21 = vmax.f32 %v1682_v41, %v1689_v46  ;;  %v1685_v26 = vsel %vm539_vm2, %v3554_v39, -inf }
 0x9e1   : > { %v1686_v52 = vmax.f32 %v1680_v51, %v1685_v26  ;;  %v1721_v41 = vmax.f32 %v1719_v22, %v1720_v2 }
 0x9e2   : > { %v1692_v57 = vmax.f32 %v1688_v4, %v1690_v21  ;;  %v1534_v59 = vpop.f32.mrb[32].mxu0 }
 0x9e3   : > { %v1691_v60 = vmax.f32 %v1684_v45, %v1686_v52  ;;  %v1535_v61 = vadd.f32 %v1534_v59, %v3390_v7  ;;  %v2627_v62 = vpop.f32.mrb[33].mxu0 }
 0x9e4   : > { %v1537_v5 = vpop.f32.mrb[34].mxu0 }
 0x9e5   : > { %v1693_v8 = vmax.f32 %v1691_v60, %v1692_v57  ;;  %v1541_v63 = vmul.f32 %v1535_v61, %v1535_v61  ;;  %v1538_v11 = vadd.f32 %v1537_v5, %v3393_v12  ;;  %v2628_v13 = vpop.f32.mrb[35].mxu0  ;;  %v1678_v12 = vmax.f32 %v1676_v17, %v1677_v30 }
 0x9e7   : > { %v1694_v15 = vrot.slane %v1693_v8, 4  ;;  %v1542_v16 = vmul.f32 %v1538_v11, %v1538_v11  ;;  %v1543_v14 = vsel %vm539_vm2, %v1541_v63, 0.0 }
 0x9e9   : > { %v1695_v18 = vmax.f32 %v1693_v8, %v1694_v15  ;;  %v1544_v24 = vsel %vm539_vm2, %v1542_v16, 0.0 }
 0x9ea   : > { %v1545_v25 = vadd.f32 %v1544_v24, %v1543_v14 }
 0x9eb   : > { %v1696_v7 = vrot.slane %v1695_v18, 2 }
 0x9ec   : > { %v1546_v29 = vrot.slane %v1545_v25, 4 }
 0x9ed   : > { %v1697_v31 = vmax.f32 %v1695_v18, %v1696_v7 }
 0x9ee   : > { %v1547_v33 = vadd.f32 %v1546_v29, %v1545_v25 }
 0x9ef   : > { %v1698_v34 = vrot.slane %v1697_v31, 1 }
 0x9f0   : > { %v1548_v4 = vrot.slane %v1547_v33, 2 }
 0x9f1   : > { %v1699_v36 = vmax.f32 %v1697_v31, %v1698_v34 }
 0x9f2   : > { %v1549_v45 = vadd.f32 %v1548_v4, %v1547_v33 }
 0x9f3   : > { %v1700_v46 = vmax.f32 %v1678_v12, %v1699_v36 }
 0x9f4   : > { %v1550_v48 = vrot.slane %v1549_v45, 1 }
 0x9f5   : > { %v3569_v51 = vmax.f32 %v1700_v46, %v1721_v41 }
 0x9f6   : > { %v1551_v21 = vadd.f32 %v1550_v48, %v1549_v45 }
 0x9f8   : > { %v1552_v26 = vmax.f32 %v1551_v21, 1e-24 }
 0x9fa   : > { %2863 = vrsqrt.f32 %v1552_v26 }
 0xa04   : > { %v2864_v52 = vpop.eup %2863 }
 0xa05   : > { %v1555_v53 = vmul.f32 %v2864_v52, %v1538_v11  ;;  %v1554_v57 = vmul.f32 %v2864_v52, %v1535_v61  ;;  %v3074_v61 = vmov -inf  }
 0xa06   : > { %941 = vst.msk [vmem:[#allocation3] sm:$0x1] %vm940_vm4, %v3074_v61 }
 0xa07   : > { %v1556_v59 = vpack.c.bf16 %v1555_v53, %v1554_v57 }
 0xa09   : > { %1557 = vxpose.xlu0.c.b16.start.end [1/1] (short) (narrow) %v1556_v59, 64 }
 0xa6f   : > { %v1565_v60 = vpop.trf.xlu0 }
 0xa70   : > { %2631 = vmatprep.mubr.msk.bf16.mxu0 %vm570_vm3, %v1565_v60 }
 0xa73   : > { %v1566_v62 = vpop.trf.xlu0 }
 0xa74   : > { %2632 = vmatmul.mubr.msk.bf16.vlgmr.msra.gmra.mrb[36].mxu0 %vm570_vm3, %v1566_v62  ;;  %v1755_v62 = vlaneseq }
 0xa76   : > { %v3592_v61 = vshrl.u32 %v1755_v62, 7 }
 0xa77   : > { %v1567_v1 = vpop.trf.xlu0 }
 0xa78   : > { %2635 = vmatprep.mubr.msk.bf16.mxu0 %vm570_vm3, %v1567_v1 }
 0xa7b   : > { %v1568_v5 = vpop.trf.xlu0 }
 0xa7c   : > { %2636 = vmatmul.mubr.msk.bf16.gmra.mrb[40].mxu0 %vm570_vm3, %v1568_v5 }
 0xa7d   : > { %2647 = vmatprep.mubr.msk.bf16.mxu0 %vm3072_vm0, %v3071_v0 }
 0xb47   : > { %v2633_v8 = vpop.f32.mrb[36].mxu0 }
 0xb48   : > { %v1619_v10 = vpop.f32.mrb[37].mxu0  ;;  %v1652_v13 = vmul.f32 30.0, %v2633_v8 }
 0xb49   : > { %v2634_v63 = vpop.f32.mrb[38].mxu0  ;;  %v1650_v15 = vmul.f32 30.0, %v1619_v10  ;;  %v3594_v10 = vld [vmem:[#allocation3] sm:$0x1] }
 0xb4a   : > { %v1622_v11 = vpop.f32.mrb[39].mxu0  ;;  %v1653_v17 = vmul.f32 30.0, %v2634_v63  ;;  %v1725_v7 = vsel %vm539_vm2, %v1652_v13, -inf }
 0xb4b   : > { %v1651_v14 = vmul.f32 30.0, %v1622_v11  ;;  %v1723_v2 = vsel %vm539_vm2, %v1650_v15, -inf  ;;  %v1757_v11 = vsub.s32 0, %v3592_v61 }
 0xb4c   : > { %v1726_v12 = vsel %vm539_vm2, %v1653_v17, -inf }
 0xb4d   : > { %v1724_v45 = vsel %vm539_vm2, %v1651_v14, -inf }
 0xb4f   : > { %v2637_v16 = vpop.f32.mrb[40].mxu0 }
 0xb50   : > { %v1656_v18 = vmul.f32 30.0, %v2637_v16  ;;  %v1635_v22 = vpop.f32.mrb[41].mxu0 }
 0xb51   : > { %v1654_v24 = vmul.f32 30.0, %v1635_v22  ;;  %v2638_v25 = vpop.f32.mrb[42].mxu0 }
 0xb52   : > { %v1731_v29 = vsel %vm539_vm2, %v1656_v18, -inf  ;;  %v1657_v30 = vmul.f32 30.0, %v2638_v25  ;;  %v1638_v31 = vpop.f32.mrb[43].mxu0 }
 0xb53   : > { %v1732_v33 = vmax.f32 %v1725_v7, %v1731_v29  ;;  %v1727_v34 = vsel %vm539_vm2, %v1654_v24, -inf  ;;  %v1655_v4 = vmul.f32 30.0, %v1638_v31 }
 0xb54   : > { %v1728_v36 = vmax.f32 %v1723_v2, %v1727_v34  ;;  %v1733_v41 = vsel %vm539_vm2, %v1657_v30, -inf }
 0xb55   : > { %v1734_v46 = vmax.f32 %v1726_v12, %v1733_v41  ;;  %v1729_v48 = vsel %vm539_vm2, %v1655_v4, -inf }
 0xb56   : > { %v1730_v21 = vmax.f32 %v1724_v45, %v1729_v48 }
 0xb57   : > { %v1736_v26 = vmax.f32 %v1732_v33, %v1734_v46 }
 0xb58   : > { %v1735_v52 = vmax.f32 %v1728_v36, %v1730_v21 }
 0xb5a   : > { %v1737_v53 = vmax.f32 %v1735_v52, %v1736_v26 }
 0xb5c   : > { %v1738_v57 = vrot.slane %v1737_v53, 4 }
 0xb5e   : > { %v1739_v59 = vmax.f32 %v1737_v53, %v1738_v57 }
 0xb60   : > { %v1740_v60 = vrot.slane %v1739_v59, 2 }
 0xb62   : > { %v1741_v1 = vmax.f32 %v1739_v59, %v1740_v60 }
 0xb64   : > { %v1742_v5 = vrot.slane %v1741_v1, 1 }
 0xb66   : > { %v1743_v8 = vmax.f32 %v1741_v1, %v1742_v5 }
 0xb68   : > { %v1744_v63 = vmax.f32 %v3569_v51, %v1743_v8 }
 0xb6a   : > { %v3599_v16 = vmax.f32 %v3594_v10, %v1744_v63 }
 0xb6c   : > { %v3604_v22 = vrot.slane %v3599_v16, %v1757_v11  ;;  %2184 = vst.msk [vmem:[#allocation3] sm:$0x1] %vm940_vm4, %v3599_v16 }
 0xb6e   : > { %v2079_v25 = vsub.f32 %v1650_v15, %v3604_v22  ;;  %v2080_v7 = vsub.f32 %v1651_v14, %v3604_v22  ;;  %v2081_v29 = vsub.f32 %v1652_v13, %v3604_v22  ;;  %v2082_v51 = vsub.f32 %v1653_v17, %v3604_v22 }
 0xb6f   : > { %v2083_v31 = vsub.f32 %v1654_v24, %v3604_v22  ;;  %v2084_v2 = vsub.f32 %v1655_v4, %v3604_v22  ;;  %v2085_v33 = vsub.f32 %v1656_v18, %v3604_v22  ;;  %v2086_v34 = vsub.f32 %v1657_v30, %v3604_v22 }
 0xb70   : > { %v2087_v12 = vmul.f32 1.442695, %v2079_v25  ;;  %v2089_v36 = vmul.f32 1.442695, %v2080_v7  ;;  %v2091_v41 = vmul.f32 1.442695, %v2081_v29  ;;  %v1768_v15 = vsub.f32 %v3443_v3, %v3604_v22 }
 0xb71   : > { %v2093_v45 = vmul.f32 1.442695, %v2082_v51  ;;  %v2095_v14 = vmul.f32 1.442695, %v2083_v31  ;;  %v1769_v13 = vsub.f32 %v3449_v6, %v3604_v22  ;;  %v2097_v17 = vmul.f32 1.442695, %v2084_v2 }
 0xb72   : > { %2865 = vpow2.f32 %v2087_v12  ;;  %v2099_v24 = vmul.f32 1.442695, %v2085_v33  ;;  %v1770_v4 = vsub.f32 %v3441_v35, %v3604_v22  ;;  %v1771_v18 = vsub.f32 %v3445_v37, %v3604_v22 }
 0xb73   : > { %2867 = vpow2.f32 %v2089_v36  ;;  %v1772_v30 = vsub.f32 %v3451_v40, %v3604_v22  ;;  %v1773_v3 = vsub.f32 %v3463_v49, %v3604_v22  ;;  %v1774_v6 = vsub.f32 %v3447_v38, %v3604_v22 }
 0xb74   : > { %2869 = vpow2.f32 %v2091_v41  ;;  %v1775_v46 = vsub.f32 %v3457_v44, %v3604_v22  ;;  %v1871_v35 = vsub.f32 %v3533_v20, %v3604_v22  ;;  %v1872_v37 = vsub.f32 %v3540_v27, %v3604_v22 }
 0xb75   : > { %2871 = vpow2.f32 %v2093_v45  ;;  %v1873_v40 = vsub.f32 %v3531_v19, %v3604_v22  ;;  %v1874_v49 = vsub.f32 %v3535_v23, %v3604_v22  ;;  %v2101_v48 = vmul.f32 1.442695, %v2086_v34 }
 0xb76   : > { %v1875_v38 = vsub.f32 %v3542_v28, %v3604_v22  ;;  %v1876_v44 = vsub.f32 %v3554_v39, %v3604_v22  ;;  %v1877_v20 = vsub.f32 %v3537_v9, %v3604_v22  ;;  %2873 = vpow2.f32 %v2095_v14 }
 0xb77   : > { %v1878_v27 = vsub.f32 %v3548_v32, %v3604_v22  ;;  %v1975_v19 = vsub.f32 %v3501_v43, %v3604_v22  ;;  %v1976_v23 = vsub.f32 %v3505_v50, %v3604_v22  ;;  %2875 = vpow2.f32 %v2097_v17 }
 0xb78   : > { %v1977_v28 = vsub.f32 %v3499_v42, %v3604_v22  ;;  %v1978_v39 = vsub.f32 %v3503_v47, %v3604_v22  ;;  %v1979_v9 = vsub.f32 %v3515_v55, %v3604_v22  ;;  %2877 = vpow2.f32 %v2099_v24 }
 0xb79   : > { %v1980_v32 = vsub.f32 %v3521_v58, %v3604_v22  ;;  %v1981_v43 = vsub.f32 %v3513_v54, %v3604_v22  ;;  %2879 = vpow2.f32 %v2101_v48  ;;  %v1776_v21 = vmul.f32 1.442695, %v1768_v15 }
 0xb7a   : > { %v1778_v50 = vmul.f32 1.442695, %v1769_v13  ;;  %v1780_v26 = vmul.f32 1.442695, %v1770_v4  ;;  %v1782_v52 = vmul.f32 1.442695, %v1771_v18  ;;  %v1747_v55 = vsub.f32 %v3594_v10, %v3599_v16 }
 0xb7b   : > { %2881 = vpow2.f32 %v1776_v21  ;;  %v1784_v57 = vmul.f32 1.442695, %v1772_v30  ;;  %v1786_v62 = vmul.f32 1.442695, %v1773_v3  ;;  %v1788_v8 = vmul.f32 1.442695, %v1774_v6 }
 0xb7c   : > { %v3662_v53 = vpop.eup %2865  ;;  %2883 = vpow2.f32 %v1778_v50  ;;  %v1790_v7 = vmul.f32 1.442695, %v1775_v46  ;;  %v1879_v51 = vmul.f32 1.442695, %v1871_v35  ;;  %v1881_v33 = vmul.f32 1.442695, %v1872_v37 }
 0xb7d   : > { %v3664_v59 = vpop.eup %2867  ;;  %v2103_v60 = vsel %vm539_vm2, %v3662_v53, 0.0  ;;  %2885 = vpow2.f32 %v1780_v26  ;;  %v1883_v34 = vmul.f32 1.442695, %v1873_v40  ;;  %v1885_v41 = vmul.f32 1.442695, %v1874_v49 }
 0xb7e   : > { %v3668_v1 = vpop.eup %2869  ;;  %v2104_v5 = vsel %vm539_vm2, %v3664_v59, 0.0  ;;  %2887 = vpow2.f32 %v1782_v52  ;;  %v1887_v15 = vmul.f32 1.442695, %v1875_v38  ;;  %v1889_v13 = vmul.f32 1.442695, %v1876_v44 }
 0xb7f   : > { %v3672_v63 = vpop.eup %2871  ;;  %v2105_v25 = vadd.f32 %v2104_v5, %v2103_v60  ;;  %v2106_v29 = vsel %vm539_vm2, %v3668_v1, 0.0  ;;  %2889 = vpow2.f32 %v1784_v57  ;;  %v1891_v17 = vmul.f32 1.442695, %v1877_v20 }
 0xb80   : > { %v3676_v31 = vpop.eup %2873  ;;  %2891 = vpow2.f32 %v1786_v62  ;;  %v2108_v36 = vsel %vm539_vm2, %v3672_v63, 0.0  ;;  %v1893_v18 = vmul.f32 1.442695, %v1878_v27  ;;  %v1983_v30 = vmul.f32 1.442695, %v1975_v19 }
 0xb81   : > { %v2107_v2 = vadd.f32 %v2106_v29, %v2105_v25  ;;  %v3678_v12 = vpop.eup %2875  ;;  %2893 = vpow2.f32 %v1788_v8  ;;  %v2110_v4 = vsel %vm539_vm2, %v3676_v31, 0.0  ;;  %v1985_v46 = vmul.f32 1.442695, %v1976_v23 }
 0xb82   : > { %v3682_v45 = vpop.eup %2877  ;;  %2895 = vpow2.f32 %v1790_v7  ;;  %v2112_v6 = vsel %vm539_vm2, %v3678_v12, 0.0  ;;  %v2128_v37 = vpack.c.bf16 %v3664_v59, %v3662_v53  ;;  %v2129_v40 = vpack.c.bf16 %v3672_v63, %v3668_v1  ;;  %v2812_v53 = vld [vmem:[%s3582_s11 + $0x18] sm:$0xff]   ;;  %v1752_v59 = vld [vmem:[#allocation5] sm:$0xff] }
 0xb83   : > { %v2109_v14 = vadd.f32 %v2108_v36, %v2107_v2  ;;  %v3684_v24 = vpop.eup %2879  ;;  %2897 = vpow2.f32 %v1879_v51  ;;  %v2130_v49 = vpack.c.bf16 %v3678_v12, %v3676_v31  ;;  %v2114_v19 = vsel %vm539_vm2, %v3682_v45, 0.0  ;;  %v1753_v1 = vld [vmem:[#allocation5 + $0x8] sm:$0xff] }
 0xb84   : > { %2899 = vpow2.f32 %v1881_v33  ;;  %v2131_v20 = vpack.c.bf16 %v3684_v24, %v3682_v45  ;;  %v1987_v57 = vmul.f32 1.442695, %v1977_v28  ;;  %v2116_v62 = vsel %vm539_vm2, %v3684_v24, 0.0 }
 0xb85   : > { %v2111_v3 = vadd.f32 %v2110_v4, %v2109_v14  ;;  %v2882_v35 = vpop.eup %2881  ;;  %2901 = vpow2.f32 %v1883_v34  ;;  %v1989_v51 = vmul.f32 1.442695, %v1978_v39  ;;  %v1982_v34 = vsub.f32 %v3517_v56, %v3604_v22 }
 0xb86   : > { %v2884_v48 = vpop.eup %2883  ;;  %v1792_v44 = vsel %vm539_vm2, %v2882_v35, 0.0  ;;  %2903 = vpow2.f32 %v1885_v41  ;;  %v1991_v41 = vmul.f32 1.442695, %v1979_v9  ;;  %v1995_v58 = vmul.f32 1.442695, %v1981_v43 }
 0xb87   : > { %v2113_v38 = vadd.f32 %v2112_v6, %v2111_v3  ;;  %v2886_v27 = vpop.eup %2885  ;;  %v1793_v23 = vsel %vm539_vm2, %v2884_v48, 0.0  ;;  %2905 = vpow2.f32 %v1887_v15  ;;  %v1816_v21 = vpack.c.bf16 %v2884_v48, %v2882_v35 }
 0xb88   : > { %v2888_v50 = vpop.eup %2887  ;;  %v1794_v52 = vadd.f32 %v1793_v23, %v1792_v44  ;;  %2907 = vpow2.f32 %v1889_v13  ;;  %v1795_v5 = vsel %vm539_vm2, %v2886_v27, 0.0  ;;  %v1993_v15 = vmul.f32 1.442695, %v1980_v32 }
 0xb89   : > { %v2115_v26 = vadd.f32 %v2114_v19, %v2113_v38  ;;  %v2890_v60 = vpop.eup %2889  ;;  %2909 = vpow2.f32 %v1891_v17  ;;  %2640 = vmatpush3.bf16.msra.mxu0 %v1816_v21  ;;  %v1817_v8 = vpack.c.bf16 %v2888_v50, %v2886_v27  ;;  %v1797_v28 = vsel %vm539_vm2, %v2888_v50, 0.0 }
 0xb8a   : > { %v2892_v25 = vpop.eup %2891  ;;  %v1796_v29 = vadd.f32 %v1795_v5, %v1794_v52  ;;  %2911 = vpow2.f32 %v1893_v18  ;;  %2641 = vmatprep.subr.bf16.mxu0 %v3071_v0  ;;  %v1799_v39 = vsel %vm539_vm2, %v2890_v60, 0.0  ;;  %v1997_v6 = vmul.f32 1.442695, %v1982_v34  ;;  %v2809_v52 = vld [vmem:[%s3582_s11] sm:$0xff]  }
 0xb8b   : > { %v3708_v7 = vadd.f32 %v2116_v62, %v2115_v26  ;;  %v2894_v42 = vpop.eup %2893  ;;  %2913 = vpow2.f32 %v1983_v30  ;;  %v1818_v2 = vpack.c.bf16 %v2892_v25, %v2890_v60  ;;  %v1801_v4 = vsel %vm539_vm2, %v2892_v25, 0.0 }
 0xb8c   : > { %v2896_v33 = vpop.eup %2895  ;;  %v1798_v36 = vadd.f32 %v1797_v28, %v1796_v29  ;;  %2915 = vpow2.f32 %v1985_v46  ;;  %v1803_v48 = vsel %vm539_vm2, %v2894_v42, 0.0  ;;  %v1748_v23 = vmul.f32 1.442695, %v1747_v55 }
 0xb8d   : > { %v2898_v47 = vpop.eup %2897  ;;  %2917 = vpow2.f32 %v1987_v57  ;;  %2642 = vmatpush3.bf16.msra.mxu0 %v1817_v8  ;;  %v1819_v14 = vpack.c.bf16 %v2896_v33, %v2894_v42  ;;  %v1805_v44 = vsel %vm539_vm2, %v2896_v33, 0.0 }
 0xb8e   : > { %v2900_v13 = vpop.eup %2899  ;;  %v1800_v17 = vadd.f32 %v1799_v39, %v1798_v36  ;;  %v1895_v56 = vsel %vm539_vm2, %v2898_v47, 0.0  ;;  %2919 = vpow2.f32 %v1989_v51  ;;  %2643 = vmatprep.subr.bf16.mxu0 %v3071_v0 }
 0xb8f   : > { %v2902_v9 = vpop.eup %2901  ;;  %v1896_v32 = vsel %vm539_vm2, %v2900_v13, 0.0  ;;  %v1920_v18 = vpack.c.bf16 %v2900_v13, %v2898_v47  ;;  %2921 = vpow2.f32 %v1991_v41 }
 0xb90   : > { %v2904_v30 = vpop.eup %2903  ;;  %v1802_v3 = vadd.f32 %v1801_v4, %v1800_v17  ;;  %v1897_v46 = vadd.f32 %v1896_v32, %v1895_v56  ;;  %v1898_v10 = vsel %vm539_vm2, %v2902_v9, 0.0  ;;  %2923 = vpow2.f32 %v1993_v15 }
 0xb91   : > { %v2906_v35 = vpop.eup %2905  ;;  %2652 = vmatpush3.bf16.msra.mxu1 %v1920_v18  ;;  %v1921_v16 = vpack.c.bf16 %v2904_v30, %v2902_v9  ;;  %2644 = vmatpush3.bf16.msra.mxu0 %v1818_v2  ;;  %v1900_v27 = vsel %vm539_vm2, %v2904_v30, 0.0  ;;  %2925 = vpow2.f32 %v1995_v58  ;;  %v2810_v30 = vld [vmem:[%s3582_s11 + $0x8] sm:$0xff]  }
 0xb92   : > { %v2908_v54 = vpop.eup %2907  ;;  %v1804_v22 = vadd.f32 %v1803_v48, %v1802_v3  ;;  %v1899_v43 = vadd.f32 %v1898_v10, %v1897_v46  ;;  %2653 = vmatprep.subr.bf16.mxu1 %v3071_v0  ;;  %2645 = vmatprep.subr.bf16.mxu0 %v3071_v0  ;;  %v1902_v60 = vsel %vm539_vm2, %v2906_v35, 0.0  ;;  %2927 = vpow2.f32 %v1997_v6 }
 0xb93   : > { %v2910_v38 = vpop.eup %2909  ;;  %v1922_v19 = vpack.c.bf16 %v2908_v54, %v2906_v35  ;;  %v1904_v42 = vsel %vm539_vm2, %v2908_v54, 0.0  ;;  %2929 = vpow2.f32 %v1748_v23  ;;  %v2118_v3 = vrot.slane %v3708_v7, 4 }
 0xb94   : > { %v2912_v21 = vpop.eup %2911  ;;  %v1806_v50 = vadd.f32 %v1805_v44, %v1804_v22  ;;  %v1901_v26 = vadd.f32 %v1900_v27, %v1899_v43  ;;  %v1906_v47 = vsel %vm539_vm2, %v2910_v38, 0.0  ;;  %v1750_v43 = vld [vmem:[#allocation4] sm:$0x1] }
 0xb95   : > { %v2914_v57 = vpop.eup %2913  ;;  %2654 = vmatpush3.bf16.msra.mxu1 %v1921_v16  ;;  %2646 = vmatpush3.bf16.msra.mxu0 %v1819_v14  ;;  %v1923_v62 = vpack.c.bf16 %v2912_v21, %v2910_v38  ;;  %v1908_v9 = vsel %vm539_vm2, %v2912_v21, 0.0  ;;  %v2119_v23 = vadd.f32 %v2118_v3, %v3708_v7 }
 0xb96   : > { %v2916_v5 = vpop.eup %2915  ;;  %v1807_v8 = vrot.slane %v1806_v50, 4  ;;  %v1903_v25 = vadd.f32 %v1902_v60, %v1901_v26  ;;  %v1999_v29 = vsel %vm539_vm2, %v2914_v57, 0.0  ;;  %2655 = vmatprep.subr.bf16.mxu1 %v3071_v0 }
 0xb97   : > { %v2918_v51 = vpop.eup %2917  ;;  %v2000_v28 = vsel %vm539_vm2, %v2916_v5, 0.0  ;;  %v2024_v2 = vpack.c.bf16 %v2916_v5, %v2914_v57 }
 0xb98   : > { %v2920_v33 = vpop.eup %2919  ;;  %v1808_v34 = vadd.f32 %v1807_v8, %v1806_v50  ;;  %v1905_v36 = vadd.f32 %v1904_v42, %v1903_v25  ;;  %v2001_v41 = vadd.f32 %v2000_v28, %v1999_v29  ;;  %2648 = vmatmul.mubr.msk.bf16.vlgmr.msra.gmra.mrb[44].mxu0 %vm539_vm2, %v2809_v52  ;;  %v2002_v39 = vsel %vm539_vm2, %v2918_v51, 0.0 }
 0xb99   : > { %2656 = vmatpush3.bf16.msra.mxu1 %v1922_v19  ;;  %v2025_v15 = vpack.c.bf16 %v2920_v33, %v2918_v51  ;;  %v2922_v14 = vpop.eup %2921  ;;  %v2004_v4 = vsel %vm539_vm2, %v2920_v33, 0.0  ;;  %v2120_v25 = vrot.slane %v2119_v23, 2 }
 0xb9a   : > { %v1809_v13 = vrot.slane %v1808_v34, 2  ;;  %v1907_v17 = vadd.f32 %v1906_v47, %v1905_v36  ;;  %v2003_v56 = vadd.f32 %v2002_v39, %v2001_v41  ;;  %2657 = vmatprep.subr.bf16.mxu1 %v3071_v0  ;;  %v2924_v55 = vpop.eup %2923  ;;  %v2006_v6 = vsel %vm539_vm2, %v2922_v14, 0.0 }
 0xb9b   : > { %v2026_v46 = vpack.c.bf16 %v2924_v55, %v2922_v14  ;;  %v2926_v35 = vpop.eup %2925  ;;  %v2008_v22 = vsel %vm539_vm2, %v2924_v55, 0.0 }
 0xb9c   : > { %v1810_v58 = vadd.f32 %v1809_v13, %v1808_v34  ;;  %v1909_v32 = vadd.f32 %v1908_v9, %v1907_v17  ;;  %v2005_v18 = vadd.f32 %v2004_v4, %v2003_v56  ;;  %v2928_v54 = vpop.eup %2927  ;;  %v2010_v21 = vsel %vm539_vm2, %v2926_v35, 0.0  ;;  %v2811_v34 = vld [vmem:[%s3582_s11 + $0x10] sm:$0xff]  }
 0xb9d   : > { %2658 = vmatpush3.bf16.msra.mxu1 %v1923_v62  ;;  %v2930_v19 = vpop.eup %2929  ;;  %v2027_v50 = vpack.c.bf16 %v2928_v54, %v2926_v35  ;;  %v2012_v62 = vsel %vm539_vm2, %v2928_v54, 0.0 }
 0xb9e   : > { %v1811_v48 = vrot.slane %v1810_v58, 1  ;;  %v1910_v10 = vrot.slane %v1909_v32, 4  ;;  %v2007_v16 = vadd.f32 %v2006_v6, %v2005_v18  ;;  %2663 = vmatprep.subr.bf16.mxu1 %v3071_v0  ;;  %v1751_v57 = vmul.f32 %v2930_v19, %v1750_v43 }
 0xb9f   : > { %v1758_v60 = vrot.slane %v2930_v19, %v1757_v11 }
 0xba0   : > { %v1812_v38 = vadd.f32 %v1811_v48, %v1810_v58  ;;  %v1911_v44 = vadd.f32 %v1910_v10, %v1909_v32  ;;  %v2009_v27 = vadd.f32 %v2008_v22, %v2007_v16  ;;  %2660 = vmatmul.mubr.msk.bf16.vlgmr.msra.gmra.mrb[24].mxu1 %vm539_vm2, %v2810_v30 }
 0xba1   : > { %2664 = vmatpush3.bf16.msra.mxu1 %v2024_v2  ;;  %2671 = vmatprep.mubr.msk.bf16.mxu1 %vm3072_vm0, %v3071_v0  ;;  %v2121_v2 = vadd.f32 %v2120_v25, %v2119_v23  ;;  %v1760_v63 = vmul.f32 %v1758_v60, %v1752_v59  ;;  %v1761_v17 = vmul.f32 %v1758_v60, %v1753_v1 }
 0xba2   : > { %v1912_v26 = vrot.slane %v1911_v44, 2  ;;  %v2011_v52 = vadd.f32 %v2010_v21, %v2009_v27  ;;  %2665 = vmatprep.subr.bf16.mxu1 %v3071_v0  ;;  %v1813_v8 = vadd.f32 %v1812_v38, %v1751_v57 }
 0xba3   : > { %v2122_v36 = vrot.slane %v2121_v2, 1 }
 0xba4   : > { %v1913_v5 = vadd.f32 %v1912_v26, %v1911_v44  ;;  %v2013_v7 = vadd.f32 %v2012_v62, %v2011_v52 }
 0xba5   : > { %2666 = vmatpush3.bf16.msra.mxu1 %v2025_v15  ;;  %v2123_v39 = vadd.f32 %v2122_v36, %v2121_v2 }
 0xba6   : > { %v1914_v29 = vrot.slane %v1913_v5, 1  ;;  %v2014_v51 = vrot.slane %v2013_v7, 4  ;;  %2667 = vmatprep.subr.bf16.mxu1 %v3071_v0 }
 0xba8   : > { %v1915_v42 = vadd.f32 %v1914_v29, %v1913_v5  ;;  %v2015_v28 = vadd.f32 %v2014_v51, %v2013_v7 }
 0xba9   : > { %2668 = vmatpush3.bf16.msra.mxu1 %v2026_v46 }
 0xbaa   : > { %v2016_v33 = vrot.slane %v2015_v28, 2  ;;  %2669 = vmatprep.subr.bf16.mxu1 %v3071_v0  ;;  %v1916_v61 = vadd.f32 %v1915_v42, %v1813_v8 }
 0xbac   : > { %v2017_v11 = vadd.f32 %v2016_v33, %v2015_v28 }
 0xbad   : > { %2670 = vmatpush3.bf16.msra.mxu1 %v2027_v50 }
 0xbae   : > { %v2018_v41 = vrot.slane %v2017_v11, 1  ;;  %2675 = vmatprep.subr.bf16.mxu1 %v3071_v0 }
 0xbb0   : > { %v2019_v47 = vadd.f32 %v2018_v41, %v2017_v11  ;;  %2672 = vmatmul.mubr.msk.bf16.vlgmr.msra.gmra.mrb[24].mxu1 %vm539_vm2, %v2811_v34 }
 0xbb1   : > { %2676 = vmatpush3.bf16.msra.mxu1 %v2128_v37  ;;  %2683 = vmatprep.mubr.msk.bf16.mxu1 %vm3072_vm0, %v3071_v0 }
 0xbb2   : > { %2677 = vmatprep.subr.bf16.mxu1 %v3071_v0  ;;  %v2020_v15 = vadd.f32 %v2019_v47, %v1916_v61 }
 0xbb4   : > { %v2124_v14 = vadd.f32 %v2123_v39, %v2020_v15 }
 0xbb5   : > { %2678 = vmatpush3.bf16.msra.mxu1 %v2129_v40 }
 0xbb6   : > { %2679 = vmatprep.subr.bf16.mxu1 %v3071_v0  ;;  %2185 = vst.msk [vmem:[#allocation4] sm:$0x1] %vm940_vm4, %v2124_v14 }
 0xbb9   : > { %2680 = vmatpush3.bf16.msra.mxu1 %v2130_v49 }
 0xbba   : > { %2681 = vmatprep.subr.bf16.mxu1 %v3071_v0 }
 0xbbd   : > { %2682 = vmatpush3.bf16.msra.mxu1 %v2131_v20  ;;  %v2448_v12 = vld [vmem:[#allocation4] ss:$0 sm:$0xff] }
 0xbbe   : > { %2931 = vrcp.f32 %v2448_v12 }
 0xbc0   : > { %2684 = vmatmul.mubr.msk.bf16.vlgmr.msra.gmra.mrb[24].mxu1 %vm539_vm2, %v2812_v53 }
 0xbc8   : > { %v2932_v20 = vpop.eup %2931 }
 0xc6b   : > { %v1862_v37 = vpop.f32.mrb[44].mxu0 }
 0xc6c   : > { %v1869_v40 = vadd.f32 %v1862_v37, %v1760_v63  ;;  %v2649_v13 = vpop.f32.mrb[45].mxu0 }
 0xc6d   : > { %v1865_v56 = vpop.f32.mrb[46].mxu0 }
 0xc6e   : > { %v1870_v55 = vadd.f32 %v1865_v56, %v1761_v17  ;;  %v2650_v31 = vpop.f32.mrb[47].mxu0 }
 0xc93   : > { %v2174_v49 = vpop.f32.mrb[24].mxu1 }
 0xc94   : > { %v2688_v0 = vadd.f32 %v2174_v49, %v1869_v40  ;;  %v2685_v9 = vpop.f32.mrb[25].mxu1 }
 0xc95   : > { %v2177_v4 = vpop.f32.mrb[26].mxu1 }
 0xc96   : > { %2186 = vst.msk [vmem:[#allocation5] sm:$0xff] %vm539_vm2, %v2688_v0  ;;  %v2690_v45 = vadd.f32 %v2177_v4, %v1870_v55  ;;  %v2686_v24 = vpop.f32.mrb[27].mxu1 }
 0xc98   : > { %2187 = vst.msk [vmem:[#allocation5 + $0x8] sm:$0xff] %vm539_vm2, %v2690_v45 }
 0xc9d   : > { %v2191_v58 = vld [vmem:[#allocation5] sm:$0xff] }
 0xc9e   : > { %v2201_v32 = vmul.f32 %v2932_v20, %v2191_v58 }
 0xc9f   : > { %v2192_v18 = vld [vmem:[#allocation5 + $0x8] sm:$0xff] }
 0xca0   : > { %v2449_v30 = vmul.f32 -1.442695, %v2201_v32  ;;  %v2202_v3 = vmul.f32 %v2932_v20, %v2192_v18 }
 0xca2   : > { %2933 = vpow2.f32 %v2449_v30  ;;  %v2450_v6 = vmul.f32 -1.442695, %v2202_v3 }
 0xca4   : > { %2935 = vpow2.f32 %v2450_v6 }
 0xcac   : > { %v2934_v46 = vpop.eup %2933 }
 0xcad   : > { %v2209_v35 = vadd.f32 1.0, %v2934_v46 }
 0xcae   : > { %v2936_v48 = vpop.eup %2935 }
 0xcaf   : > { %2937 = vrcp.f32 %v2209_v35  ;;  %v2210_v10 = vadd.f32 1.0, %v2936_v48 }
 0xcb1   : > { %2939 = vrcp.f32 %v2210_v10 }
 0xcb9   : > { %v2938_v16 = vpop.eup %2937 }
 0xcba   : > { %2215 = vst.msk [vmem:[%s445_s16] sm:$0xff] %vm539_vm2, %v2938_v16 }
 0xcbb   : > { %v2940_v54 = vpop.eup %2939 }
 0xcbc   : > { %2216 = vst.msk [vmem:[%s445_s16 + $0x8] sm:$0xff] %vm539_vm2, %v2940_v54 }
 0xcbd   : > { %2982 = shalt.err (!%p2979_p13)
}
 0xcbe   : > { %s2983_s9 = scalar_lea.hbm %s3797_s18, 256  ;;  %s2987_s21 = scalar_lea.hbm %s3857_s7, 512 }
 0xcbf   : > { %p2984_p0 = scmp.ne.s32.totalorder %s3797_s18, %s2983_s9  ;;  %p2988_p9 = scmp.lt.u32.totalorder %s3797_s18, %s3857_s7 }
 0xcc0   : > { %p2989_p11 = scmp.lt.u32.totalorder %s2987_s21, %s2983_s9  ;;  %p2991_p4 = scmp.lt.u32.totalorder %s2983_s9, %s3797_s18 }
 0xcc1   : > { %p2985_p2 = pnand %p2984_p0, %p3875_p8 }
 0xcc2   : > { %p2990_p12 = por %p2989_p11, %p2988_p9 }
 0xcc3   : > { %p2986_p3 = pneg %p2985_p2 }
 0xcc4   : > { %p2992_p1 = por %p2991_p4, %p2990_p12 }
 0xcc6   : > { %p2993_p5 = pnand %p2992_p1, %p2986_p3 }
 0xcc8   : > { %2996 = shalt.err (!%p2993_p5)
}
 0xcc9   : > { %s3076_s8 = smov 128   ;;  %s3077_s23 = smov 8  }
 0xcca   : > { %2723 = dma.vmem_to_hbm [thread:$0]  (%p3875_p8), %s3799_s12, 256, %s3797_s18, %s2218_s19, %s3076_s8, %s3076_s8, %s3077_s23  }
 0xccb PF: > { %s3876_s16 = sld [smem:[#allocation25_spill]]  ;;  %s2246_s30 = sand.u32 1, %s3035_s24  }
 0xccc   : > { %p3878_p7 = scmp.ge.s32.totalorder %s3055_s29, 2  ;;  %s2247_s13 = scalar_lea.sflag [#allocation8], %s2246_s30 }
 0xcd1   : > { %p3877_p6 = scmp.ne.s32.totalorder %s3876_s16, 0 }
 0xcd3   : > { %p2726_p10 = pnand %p3878_p7, %p3877_p6 }
 0xcd5   : > { %3030 = dma.done.wait (!%p2726_p10), %s2247_s13, 256  }
 0xcd6   : > { %3032 = vsyncadd (!%p2726_p10), %s2247_s13, 4294967040  ;;  %s26_s29 = sadd.s32 1, %s3055_s29   ;;  %s3879_s27 = sld [smem:[#allocation22_spill]] }
 0xcd7   : > { %p23_p13 = scmp.ge.s32.totalorder %s26_s29, 4   ;;  %s3880_s26 = sld [smem:[#allocation24_spill]] }
 0xcd8   : > { %s3881_s14 = sld [smem:[#allocation23_spill]]  ;;  %s3882_s24 = smov %s3039_s25 }
 0xcd9   :  { %25 = sbr.rel (!%p23_p13) target bundleno = 10 (0xa), region = 141 }
 0xcdc   : > { %s3883_s25 = smov %s3879_s27  ;;  %s3884_s27 = smov %s3051_s28 }
 0xcde   : > { %s3885_s28 = smov %s3881_s14 }
 0xce0   :  { %2252 = vsyncpa [#allocation7], 1 }
 0xce1   :  { %2254 = vsyncpa [#allocation7 + $0x1], 1 }
 0xce2   :  { %2255 = vsyncpa [#allocation10], 1 }
 0xce3   :  { %2257 = vsyncpa [#allocation10 + $0x1], 1 }
 0xce4   :  { %2258 = vsyncpa [#allocation8], 1 }
 0xce5   :  { %2260 = vsyncpa [#allocation8 + $0x1], 1 }

</bundles_post_ra>
